<compile_context>
chip_gen: v7x
topology: tpu7x:2x2x1
jax: 0.10.0
libtpu: 0.0.40
codegen_flags: <defaults>
</compile_context>

<pallas_src>
import math

import jax
import jax.numpy as jnp
from jax import lax
from jax.experimental import pallas as pl
from jax.experimental.pallas import tpu as pltpu

# ---- small-but-TPU-friendly model config (ModelArgs analogue) ----
DIM = 128            # args.dim
N_HEADS = 4          # args.n_heads
HEAD_DIM = DIM // N_HEADS          # 32
SEQ = 16
BATCH = 2
ROWS = BATCH * SEQ                 # batch folded into the row axis
MULTIPLE_OF = 128    # args.multiple_of
NORM_EPS = 1e-5      # args.norm_eps
ROPE_BASE = 10000.0
MAX_SEQ = 64         # rotary cache length (>= SEQ)
NEG_INF = -1e30


def _ffn_hidden_dim(dim: int, multiple_of: int) -> int:
    hidden = 4 * dim
    hidden = int(2 * hidden / 3)
    return multiple_of * ((hidden + multiple_of - 1) // multiple_of)


HIDDEN = _ffn_hidden_dim(DIM, MULTIPLE_OF)  # 384


def _lane_roll(t, shift):
    """Full-width lane rotation: out[:, l] = t[:, (l - shift) % n] (== jnp.roll(t, shift, 1)).

    Kept as an aligned slice+concat so the rotation direction is unambiguous.
    # TODO(synk): swap for pltpu.roll(t, shift, 1) (XLU rotate) once its direction is
    # verified on hardware — it is a drop-in replacement here.
    """
    n = t.shape[1]
    return jnp.concatenate([t[:, n - shift:], t[:, :n - shift]], axis=1)


# ----------------------------- Pallas kernel -----------------------------
def transformer_block_kernel(
    x_ref, cos_ref, sinp_ref, sinm_ref,
    anorm_ref, wqkv_ref, wo_ref,
    fnorm_ref, w13_ref, w2_ref,
    o_ref, attn_scratch,
):
    x = x_ref[...]                                           # (ROWS, D) f32

    # ---- attention_norm (RMSNorm, f32) ----
    var = jnp.mean(x * x, axis=-1, keepdims=True)
    xn = x * lax.rsqrt(var + NORM_EPS) * anorm_ref[...]

    # ---- fused Q/K/V projection: one bf16 MXU matmul, f32 accumulate ----
    qkv = jnp.dot(xn.astype(jnp.bfloat16), wqkv_ref[...],
                  preferred_element_type=jnp.float32)        # (ROWS, 3*D)
    xq = qkv[:, :DIM]            # 1/sqrt(head_dim) already folded into wq (host side)
    xk = qkv[:, DIM:2 * DIM]
    xv = qkv[:, 2 * DIM:]

    # ---- RoPE, applied once on the full (ROWS, D) q/k ----
    cos = cos_ref[...]
    sinp = sinp_ref[...]          # +sin on 2nd half of each head, 0 elsewhere
    sinm = sinm_ref[...]          # -sin on 1st half of each head, 0 elsewhere

    def rope(t):
        return (t * cos
                + _lane_roll(t, HEAD_DIM // 2) * sinp
                + _lane_roll(t, DIM - HEAD_DIM // 2) * sinm)

    q_bf = rope(xq).astype(jnp.bfloat16)
    k_bf = rope(xk).astype(jnp.bfloat16)
    v_bf = xv.astype(jnp.bfloat16)

    # ---- block-diagonal causal mask generated in-kernel (no HBM mask input) ----
    # TODO(synk): an arbitrary user-supplied Optional[mask] would be passed as an extra
    # (S, S) input instead; the standard causal mask is built here from iota.
    r = lax.broadcasted_iota(jnp.int32, (ROWS, ROWS), 0)
    c = lax.broadcasted_iota(jnp.int32, (ROWS, ROWS), 1)
    same_batch = None
    for bi in range(BATCH):                                   # static unroll (BATCH=2)
        lo = bi * SEQ
        hi = lo + SEQ
        blk = jnp.logical_and(jnp.logical_and(r >= lo, r < hi),
                              jnp.logical_and(c >= lo, c < hi))
        same_batch = blk if same_batch is None else jnp.logical_or(same_batch, blk)
    allowed = jnp.logical_and(c <= r, same_batch)

    # ---- attention: one (ROWS, HD) x (HD, ROWS) score matmul per head, both batch
    #      elements at once (cross-batch blocks are masked out) ----
    nt_dims = (((1,), (1,)), ((), ()))
    for h in range(N_HEADS):                                  # static unroll, 4 heads
        c0 = h * HEAD_DIM
        q = q_bf[:, c0:c0 + HEAD_DIM]
        k = k_bf[:, c0:c0 + HEAD_DIM]
        v = v_bf[:, c0:c0 + HEAD_DIM]
        s = lax.dot_general(q, k, nt_dims, preferred_element_type=jnp.float32)
        s = jnp.where(allowed, s, NEG_INF)
        s = s - jnp.max(s, axis=-1, keepdims=True)
        p = jnp.exp(s)                                        # EUP
        p = p * pl.reciprocal(jnp.sum(p, axis=-1, keepdims=True), approx=True)
        attn_scratch[:, c0:c0 + HEAD_DIM] = jnp.dot(
            p.astype(jnp.bfloat16), v, preferred_element_type=jnp.float32)

    # ---- output projection + first residual ----
    attn = jnp.dot(attn_scratch[...].astype(jnp.bfloat16), wo_ref[...],
                   preferred_element_type=jnp.float32)
    h1 = x + attn

    # ---- ffn_norm (RMSNorm, f32) ----
    var2 = jnp.mean(h1 * h1, axis=-1, keepdims=True)
    hn = h1 * lax.rsqrt(var2 + NORM_EPS) * fnorm_ref[...]

    # ---- SwiGLU FFN: fused w1|w3 matmul, silu via exp + approx reciprocal (EUP) ----
    g13 = jnp.dot(hn.astype(jnp.bfloat16), w13_ref[...],
                  preferred_element_type=jnp.float32)         # (ROWS, 2*HIDDEN)
    a = g13[:, :HIDDEN]
    b = g13[:, HIDDEN:]
    silu_a = a * pl.reciprocal(1.0 + jnp.exp(-a), approx=True)
    ff = jnp.dot((silu_a * b).astype(jnp.bfloat16), w2_ref[...],
                 preferred_element_type=jnp.float32)

    o_ref[...] = h1 + ff                                      # second residual


# ----------------------------- wrapper -----------------------------
def transformer_block(x, position_ids, params, cos_cached, sin_cached):
    """x: (B, S, D) f32; position_ids: (B, S) int32; params: f32 weights (in, out) layout."""
    B, S, D = x.shape
    assert (B, S, D) == (BATCH, SEQ, DIM)
    scale = 1.0 / math.sqrt(HEAD_DIM)

    # Host-side (one-time) weight prep: fuse, fold the attention scale, cast to bf16.
    wqkv = jnp.concatenate(
        [params["wq"] * scale, params["wk"], params["wv"]], axis=1).astype(jnp.bfloat16)
    w13 = jnp.concatenate([params["w1"], params["w3"]], axis=1).astype(jnp.bfloat16)
    wo = params["wo"].astype(jnp.bfloat16)
    w2 = params["w2"].astype(jnp.bfloat16)

    # RoPE tables: gather by position_ids, tile per head to full width D, and fold the
    # rotate_half sign into two masked sin tables (used with the in-kernel lane rolls).
    cos_g = cos_cached[position_ids]                          # (B, S, HEAD_DIM)
    sin_g = sin_cached[position_ids]
    cos_full = jnp.tile(cos_g, (1, 1, N_HEADS)).reshape(B * S, D)
    sin_full = jnp.tile(sin_g, (1, 1, N_HEADS)).reshape(B * S, D)
    first_half = (jnp.arange(D) % HEAD_DIM) < (HEAD_DIM // 2)
    sin_p = jnp.where(first_half, 0.0, sin_full)
    sin_m = jnp.where(first_half, -sin_full, 0.0)

    x2 = x.reshape(B * S, D)

    def full_spec(shape):
        return pl.BlockSpec(shape, lambda i: (0, 0))

    in_specs = [
        full_spec((ROWS, D)),           # x (batch folded into rows)
        full_spec((ROWS, D)),           # cos
        full_spec((ROWS, D)),           # sin (+ on 2nd half of each head)
        full_spec((ROWS, D)),           # sin (- on 1st half of each head)
        full_spec((1, D)),              # attention_norm.weight (f32)
        full_spec((D, 3 * D)),          # fused wq|wk|wv (bf16, scale folded into wq)
        full_spec((D, D)),              # wo (bf16)
        full_spec((1, D)),              # ffn_norm.weight (f32)
        full_spec((D, 2 * HIDDEN)),     # fused w1|w3 (bf16)
        full_spec((HIDDEN, D)),         # w2 (bf16)
    ]

    # Single grid step => weights are DMA'd exactly once.  On 2-TC v7x, a grid=(2,)
    # "parallel" split over batch halves would use both cores.
    # TODO(synk): at real Llama widths the all-weights-resident layout exceeds VMEM
    # (v7x: 64 MiB); a K/N-tiled grid with an f32 accumulator is required before scaling up.
    out = pl.pallas_call(
        transformer_block_kernel,
        out_shape=jax.ShapeDtypeStruct((ROWS, D), jnp.float32),
        grid=(1,),
        in_specs=in_specs,
        out_specs=full_spec((ROWS, D)),
        scratch_shapes=[pltpu.VMEM((ROWS, D), jnp.float32)],
        compiler_params=pltpu.CompilerParams(dimension_semantics=("arbitrary",)),
    )(x2, cos_full, sin_p, sin_m,
      params["attn_norm"], wqkv, wo,
      params["ffn_norm"], w13, w2)
    return out.reshape(B, S, D)


# ------------------------- host-side glue / reference -------------------------
def make_rope_tables(max_seq, head_dim, base=ROPE_BASE):
    inv_freq = 1.0 / (base ** (jnp.arange(0, head_dim, 2, dtype=jnp.float32) / head_dim))
    t = jnp.arange(max_seq, dtype=jnp.float32)
    freqs = jnp.einsum("i,j->ij", t, inv_freq)
    emb = jnp.concatenate([freqs, freqs], axis=-1)            # (max_seq, head_dim)
    return jnp.cos(emb), jnp.sin(emb)


def ref_transformer_block(x, position_ids, mask, params, cos_cached, sin_cached):
    # Pure-JAX f32 reference mirroring the PyTorch forward pass exactly.
    def rms(t, w):
        return t * lax.rsqrt(jnp.mean(t * t, axis=-1, keepdims=True) + NORM_EPS) * w

    B, S, D = x.shape
    xn = rms(x, params["attn_norm"])
    q, k, v = xn @ params["wq"], xn @ params["wk"], xn @ params["wv"]

    def heads(t):
        return t.reshape(B, S, N_HEADS, HEAD_DIM).transpose(0, 2, 1, 3)

    q, k, v = heads(q), heads(k), heads(v)
    cos = cos_cached[position_ids][:, None]                   # (B, 1, S, HEAD_DIM)
    sin = sin_cached[position_ids][:, None]

    def rot(t):
        t1, t2 = t[..., :HEAD_DIM // 2], t[..., HEAD_DIM // 2:]
        return jnp.concatenate([-t2, t1], axis=-1)

    q = q * cos + rot(q) * sin
    k = k * cos + rot(k) * sin
    s = jnp.einsum("bhqd,bhkd->bhqk", q, k) / math.sqrt(HEAD_DIM) + mask
    a = jax.nn.softmax(s, axis=-1)
    o = jnp.einsum("bhqk,bhkd->bhqd", a, v)
    o = o.transpose(0, 2, 1, 3).reshape(B, S, D) @ params["wo"]
    h = x + o
    hn = rms(h, params["ffn_norm"])
    ff = (jax.nn.silu(hn @ params["w1"]) * (hn @ params["w3"])) @ params["w2"]
    return h + ff


if __name__ == "__main__":
    key = jax.random.PRNGKey(0)
    ks = jax.random.split(key, 10)

    x = jax.random.normal(ks[0], (BATCH, SEQ, DIM), dtype=jnp.float32)
    position_ids = jnp.broadcast_to(jnp.arange(SEQ, dtype=jnp.int32), (BATCH, SEQ))

    params = {
        "attn_norm": 1.0 + 0.1 * jax.random.normal(ks[1], (1, DIM), jnp.float32),
        "ffn_norm":  1.0 + 0.1 * jax.random.normal(ks[2], (1, DIM), jnp.float32),
        "wq": 0.05 * jax.random.normal(ks[3], (DIM, DIM), jnp.float32),
        "wk": 0.05 * jax.random.normal(ks[4], (DIM, DIM), jnp.float32),
        "wv": 0.05 * jax.random.normal(ks[5], (DIM, DIM), jnp.float32),
        "wo": 0.05 * jax.random.normal(ks[6], (DIM, DIM), jnp.float32),
        "w1": 0.05 * jax.random.normal(ks[7], (DIM, HIDDEN), jnp.float32),
        "w2": 0.05 * jax.random.normal(ks[8], (HIDDEN, DIM), jnp.float32),
        "w3": 0.05 * jax.random.normal(ks[9], (DIM, HIDDEN), jnp.float32),
    }

    # TODO(synk): LlamaRotaryEmbedding's dynamic cache regrowth (seq_len > cached) is a
    # host-side buffer rebuild; handled here by sizing MAX_SEQ >= SEQ.
    cos_cached, sin_cached = make_rope_tables(MAX_SEQ, HEAD_DIM)

    out = jax.block_until_ready(
        transformer_block(x, position_ids, params, cos_cached, sin_cached))

    # Reference uses the explicit additive causal mask (same semantics as in-kernel mask).
    mask = jnp.triu(jnp.full((SEQ, SEQ), NEG_INF, dtype=jnp.float32), k=1)
    ref = jax.block_until_ready(
        ref_transformer_block(x, position_ids, mask, params, cos_cached, sin_cached))

    assert out.shape == (BATCH, SEQ, DIM)
    max_err = float(jnp.max(jnp.abs(out - ref)))
    # bf16 MXU matmuls + approx reciprocals vs. f32 reference -> loose tolerance.
    assert jnp.allclose(out, ref, atol=5e-2, rtol=5e-2), f"max_abs_err={max_err}"
    print("KERNEL_OK")
</pallas_src>

<mosaic_0001>
module attributes {stable_mosaic.version = 11 : i64} {
  func.func @transformer_block_kernel(%arg0: i32, %arg1: memref<32x128xf32, #tpu.memory_space<vmem>>, %arg2: memref<32x128xf32, #tpu.memory_space<vmem>>, %arg3: memref<32x128xf32, #tpu.memory_space<vmem>>, %arg4: memref<32x128xf32, #tpu.memory_space<vmem>>, %arg5: memref<1x128xf32, #tpu.memory_space<vmem>>, %arg6: memref<128x384xbf16, #tpu.memory_space<vmem>>, %arg7: memref<128x128xbf16, #tpu.memory_space<vmem>>, %arg8: memref<1x128xf32, #tpu.memory_space<vmem>>, %arg9: memref<128x768xbf16, #tpu.memory_space<vmem>>, %arg10: memref<384x128xbf16, #tpu.memory_space<vmem>>, %arg11: memref<32x128xf32, #tpu.memory_space<vmem>>, %arg12: memref<32x128xf32, #tpu.memory_space<vmem>>) attributes {dimension_semantics = [#tpu.dimension_semantics<arbitrary>], iteration_bounds = array<i64: 1>, scalar_prefetch = 0 : i64, scratch_operands = 1 : i64, tpu.core_type = #tpu.core_type<tc>, window_params = [{pipeline_mode = #tpu.pipeline_mode<synchronous>, transform_indices = @transform_0, window_bounds = array<i64: 32, 128>}, {pipeline_mode = #tpu.pipeline_mode<synchronous>, transform_indices = @transform_1, window_bounds = array<i64: 32, 128>}, {pipeline_mode = #tpu.pipeline_mode<synchronous>, transform_indices = @transform_2, window_bounds = array<i64: 32, 128>}, {pipeline_mode = #tpu.pipeline_mode<synchronous>, transform_indices = @transform_3, window_bounds = array<i64: 32, 128>}, {pipeline_mode = #tpu.pipeline_mode<synchronous>, transform_indices = @transform_4, window_bounds = array<i64: 1, 128>}, {pipeline_mode = #tpu.pipeline_mode<synchronous>, transform_indices = @transform_5, window_bounds = array<i64: 128, 384>}, {pipeline_mode = #tpu.pipeline_mode<synchronous>, transform_indices = @transform_6, window_bounds = array<i64: 128, 128>}, {pipeline_mode = #tpu.pipeline_mode<synchronous>, transform_indices = @transform_7, window_bounds = array<i64: 1, 128>}, {pipeline_mode = #tpu.pipeline_mode<synchronous>, transform_indices = @transform_8, window_bounds = array<i64: 128, 768>}, {pipeline_mode = #tpu.pipeline_mode<synchronous>, transform_indices = @transform_9, window_bounds = array<i64: 384, 128>}, {pipeline_mode = #tpu.pipeline_mode<synchronous>, transform_indices = @transform_10, window_bounds = array<i64: 32, 128>}]} {
    %c0 = arith.constant 0 : index
    %c0_0 = arith.constant 0 : index
    %0 = vector.load %arg1[%c0, %c0_0] : memref<32x128xf32, #tpu.memory_space<vmem>>, vector<32x128xf32>
    %1 = arith.mulf %0, %0 : vector<32x128xf32>
    %cst = arith.constant dense<0.000000e+00> : vector<32xf32>
    %2 = vector.multi_reduction <add>, %1, %cst [1] : vector<32x128xf32> to vector<32xf32>
    %3 = vector.shape_cast %2 : vector<32xf32> to vector<32x1xf32>
    %cst_1 = arith.constant 1.280000e+02 : f32
    %4 = vector.broadcast %cst_1 : f32 to vector<32x1xf32>
    %5 = arith.divf %3, %4 : vector<32x1xf32>
    %cst_2 = arith.constant 9.99999974E-6 : f32
    %6 = vector.broadcast %cst_2 : f32 to vector<32x1xf32>
    %7 = arith.addf %5, %6 : vector<32x1xf32>
    %8 = math.rsqrt %7 : vector<32x1xf32>
    %9 = vector.broadcast %8 : vector<32x1xf32> to vector<32x128xf32>
    %10 = arith.mulf %0, %9 : vector<32x128xf32>
    %c0_3 = arith.constant 0 : index
    %c0_4 = arith.constant 0 : index
    %11 = vector.load %arg5[%c0_3, %c0_4] : memref<1x128xf32, #tpu.memory_space<vmem>>, vector<1x128xf32>
    %12 = vector.broadcast %11 : vector<1x128xf32> to vector<32x128xf32>
    %13 = arith.mulf %10, %12 : vector<32x128xf32>
    %14 = arith.truncf %13 : vector<32x128xf32> to vector<32x128xbf16>
    %c0_5 = arith.constant 0 : index
    %c0_6 = arith.constant 0 : index
    %15 = vector.load %arg6[%c0_5, %c0_6] : memref<128x384xbf16, #tpu.memory_space<vmem>>, vector<128x384xbf16>
    %cst_7 = arith.constant dense<0.000000e+00> : vector<32x384xf32>
    %16 = tpu.matmul %14, %15, %cst_7 {dimension_numbers = #tpu.dot_dimension_numbers<[1], [0], [0], [1], [0, 0, 1, 1], [], []>} : vector<32x128xbf16>, vector<128x384xbf16>, vector<32x384xf32> -> vector<32x384xf32>
    %17 = vector.extract_strided_slice %16 {offsets = [0, 0], sizes = [32, 128], strides = [1, 1]} : vector<32x384xf32> to vector<32x128xf32>
    %18 = vector.extract_strided_slice %16 {offsets = [0, 128], sizes = [32, 128], strides = [1, 1]} : vector<32x384xf32> to vector<32x128xf32>
    %19 = vector.extract_strided_slice %16 {offsets = [0, 256], sizes = [32, 128], strides = [1, 1]} : vector<32x384xf32> to vector<32x128xf32>
    %c0_8 = arith.constant 0 : index
    %c0_9 = arith.constant 0 : index
    %20 = vector.load %arg2[%c0_8, %c0_9] : memref<32x128xf32, #tpu.memory_space<vmem>>, vector<32x128xf32>
    %c0_10 = arith.constant 0 : index
    %c0_11 = arith.constant 0 : index
    %21 = vector.load %arg3[%c0_10, %c0_11] : memref<32x128xf32, #tpu.memory_space<vmem>>, vector<32x128xf32>
    %c0_12 = arith.constant 0 : index
    %c0_13 = arith.constant 0 : index
    %22 = vector.load %arg4[%c0_12, %c0_13] : memref<32x128xf32, #tpu.memory_space<vmem>>, vector<32x128xf32>
    %23 = arith.mulf %17, %20 : vector<32x128xf32>
    %24 = vector.extract_strided_slice %17 {offsets = [0, 112], sizes = [32, 16], strides = [1, 1]} : vector<32x128xf32> to vector<32x16xf32>
    %25 = vector.extract_strided_slice %17 {offsets = [0, 0], sizes = [32, 112], strides = [1, 1]} : vector<32x128xf32> to vector<32x112xf32>
    %26 = tpu.concatenate %24, %25 in 1 : vector<32x16xf32>, vector<32x112xf32> -> vector<32x128xf32>
    %27 = arith.mulf %26, %21 : vector<32x128xf32>
    %28 = arith.addf %23, %27 : vector<32x128xf32>
    %29 = vector.extract_strided_slice %17 {offsets = [0, 16], sizes = [32, 112], strides = [1, 1]} : vector<32x128xf32> to vector<32x112xf32>
    %30 = vector.extract_strided_slice %17 {offsets = [0, 0], sizes = [32, 16], strides = [1, 1]} : vector<32x128xf32> to vector<32x16xf32>
    %31 = tpu.concatenate %29, %30 in 1 : vector<32x112xf32>, vector<32x16xf32> -> vector<32x128xf32>
    %32 = arith.mulf %31, %22 : vector<32x128xf32>
    %33 = arith.addf %28, %32 : vector<32x128xf32>
    %34 = arith.truncf %33 : vector<32x128xf32> to vector<32x128xbf16>
    %35 = arith.mulf %18, %20 : vector<32x128xf32>
    %36 = vector.extract_strided_slice %18 {offsets = [0, 112], sizes = [32, 16], strides = [1, 1]} : vector<32x128xf32> to vector<32x16xf32>
    %37 = vector.extract_strided_slice %18 {offsets = [0, 0], sizes = [32, 112], strides = [1, 1]} : vector<32x128xf32> to vector<32x112xf32>
    %38 = tpu.concatenate %36, %37 in 1 : vector<32x16xf32>, vector<32x112xf32> -> vector<32x128xf32>
    %39 = arith.mulf %38, %21 : vector<32x128xf32>
    %40 = arith.addf %35, %39 : vector<32x128xf32>
    %41 = vector.extract_strided_slice %18 {offsets = [0, 16], sizes = [32, 112], strides = [1, 1]} : vector<32x128xf32> to vector<32x112xf32>
    %42 = vector.extract_strided_slice %18 {offsets = [0, 0], sizes = [32, 16], strides = [1, 1]} : vector<32x128xf32> to vector<32x16xf32>
    %43 = tpu.concatenate %41, %42 in 1 : vector<32x112xf32>, vector<32x16xf32> -> vector<32x128xf32>
    %44 = arith.mulf %43, %22 : vector<32x128xf32>
    %45 = arith.addf %40, %44 : vector<32x128xf32>
    %46 = arith.truncf %45 : vector<32x128xf32> to vector<32x128xbf16>
    %47 = arith.truncf %19 : vector<32x128xf32> to vector<32x128xbf16>
    %48 = tpu.iota {dimensions = array<i32: 0>} : vector<32x32xi32>
    %49 = tpu.iota {dimensions = array<i32: 1>} : vector<32x32xi32>
    %c0_i32 = arith.constant 0 : i32
    %50 = vector.broadcast %c0_i32 : i32 to vector<32x32xi32>
    %51 = arith.cmpi sge, %48, %50 : vector<32x32xi32>
    %c16_i32 = arith.constant 16 : i32
    %52 = vector.broadcast %c16_i32 : i32 to vector<32x32xi32>
    %53 = arith.cmpi slt, %48, %52 : vector<32x32xi32>
    %54 = arith.andi %51, %53 : vector<32x32xi1>
    %c0_i32_14 = arith.constant 0 : i32
    %55 = vector.broadcast %c0_i32_14 : i32 to vector<32x32xi32>
    %56 = arith.cmpi sge, %49, %55 : vector<32x32xi32>
    %c16_i32_15 = arith.constant 16 : i32
    %57 = vector.broadcast %c16_i32_15 : i32 to vector<32x32xi32>
    %58 = arith.cmpi slt, %49, %57 : vector<32x32xi32>
    %59 = arith.andi %56, %58 : vector<32x32xi1>
    %60 = arith.andi %54, %59 : vector<32x32xi1>
    %c16_i32_16 = arith.constant 16 : i32
    %61 = vector.broadcast %c16_i32_16 : i32 to vector<32x32xi32>
    %62 = arith.cmpi sge, %48, %61 : vector<32x32xi32>
    %c32_i32 = arith.constant 32 : i32
    %63 = vector.broadcast %c32_i32 : i32 to vector<32x32xi32>
    %64 = arith.cmpi slt, %48, %63 : vector<32x32xi32>
    %65 = arith.andi %62, %64 : vector<32x32xi1>
    %c16_i32_17 = arith.constant 16 : i32
    %66 = vector.broadcast %c16_i32_17 : i32 to vector<32x32xi32>
    %67 = arith.cmpi sge, %49, %66 : vector<32x32xi32>
    %c32_i32_18 = arith.constant 32 : i32
    %68 = vector.broadcast %c32_i32_18 : i32 to vector<32x32xi32>
    %69 = arith.cmpi slt, %49, %68 : vector<32x32xi32>
    %70 = arith.andi %67, %69 : vector<32x32xi1>
    %71 = arith.andi %65, %70 : vector<32x32xi1>
    %72 = arith.ori %60, %71 : vector<32x32xi1>
    %73 = arith.cmpi sle, %49, %48 : vector<32x32xi32>
    %74 = arith.andi %73, %72 : vector<32x32xi1>
    %75 = vector.extract_strided_slice %34 {offsets = [0, 0], sizes = [32, 32], strides = [1, 1]} : vector<32x128xbf16> to vector<32x32xbf16>
    %76 = vector.extract_strided_slice %46 {offsets = [0, 0], sizes = [32, 32], strides = [1, 1]} : vector<32x128xbf16> to vector<32x32xbf16>
    %77 = vector.extract_strided_slice %47 {offsets = [0, 0], sizes = [32, 32], strides = [1, 1]} : vector<32x128xbf16> to vector<32x32xbf16>
    %cst_19 = arith.constant dense<0.000000e+00> : vector<32x32xf32>
    %78 = tpu.matmul %75, %76, %cst_19 {dimension_numbers = #tpu.dot_dimension_numbers<[1], [1], [0], [0], [0, 0, 1, 0], [], []>} : vector<32x32xbf16>, vector<32x32xbf16>, vector<32x32xf32> -> vector<32x32xf32>
    %cst_20 = arith.constant -1.000000e+30 : f32
    %79 = vector.broadcast %cst_20 : f32 to vector<32x32xf32>
    %80 = arith.select %74, %78, %79 : vector<32x32xi1>, vector<32x32xf32>
    %cst_21 = arith.constant dense<0xFF800000> : vector<32xf32>
    %81 = vector.multi_reduction <maximumf>, %80, %cst_21 [1] : vector<32x32xf32> to vector<32xf32>
    %82 = vector.shape_cast %81 : vector<32xf32> to vector<32x1xf32>
    %83 = vector.broadcast %82 : vector<32x1xf32> to vector<32x32xf32>
    %84 = arith.subf %80, %83 : vector<32x32xf32>
    %85 = math.exp %84 : vector<32x32xf32>
    %cst_22 = arith.constant dense<0.000000e+00> : vector<32xf32>
    %86 = vector.multi_reduction <add>, %85, %cst_22 [1] : vector<32x32xf32> to vector<32xf32>
    %87 = vector.shape_cast %86 : vector<32xf32> to vector<32x1xf32>
    %88 = tpu.reciprocal %87 {approx = true} : vector<32x1xf32> -> vector<32x1xf32>
    %89 = vector.broadcast %88 : vector<32x1xf32> to vector<32x32xf32>
    %90 = arith.mulf %85, %89 : vector<32x32xf32>
    %91 = arith.truncf %90 : vector<32x32xf32> to vector<32x32xbf16>
    %cst_23 = arith.constant dense<0.000000e+00> : vector<32x32xf32>
    %92 = tpu.matmul %91, %77, %cst_23 {dimension_numbers = #tpu.dot_dimension_numbers<[1], [0], [0], [1], [0, 0, 1, 1], [], []>} : vector<32x32xbf16>, vector<32x32xbf16>, vector<32x32xf32> -> vector<32x32xf32>
    %c0_24 = arith.constant 0 : index
    %c0_25 = arith.constant 0 : index
    %93 = vector.load %arg12[%c0_24, %c0_25] : memref<32x128xf32, #tpu.memory_space<vmem>>, vector<32x32xf32>
    tpu.vector_store %arg12[%c0_24, %c0_25], %92 {strides = array<i32>} : memref<32x128xf32, #tpu.memory_space<vmem>>, vector<32x32xf32>,
    %94 = vector.extract_strided_slice %34 {offsets = [0, 32], sizes = [32, 32], strides = [1, 1]} : vector<32x128xbf16> to vector<32x32xbf16>
    %95 = vector.extract_strided_slice %46 {offsets = [0, 32], sizes = [32, 32], strides = [1, 1]} : vector<32x128xbf16> to vector<32x32xbf16>
    %96 = vector.extract_strided_slice %47 {offsets = [0, 32], sizes = [32, 32], strides = [1, 1]} : vector<32x128xbf16> to vector<32x32xbf16>
    %cst_26 = arith.constant dense<0.000000e+00> : vector<32x32xf32>
    %97 = tpu.matmul %94, %95, %cst_26 {dimension_numbers = #tpu.dot_dimension_numbers<[1], [1], [0], [0], [0, 0, 1, 0], [], []>} : vector<32x32xbf16>, vector<32x32xbf16>, vector<32x32xf32> -> vector<32x32xf32>
    %cst_27 = arith.constant -1.000000e+30 : f32
    %98 = vector.broadcast %cst_27 : f32 to vector<32x32xf32>
    %99 = arith.select %74, %97, %98 : vector<32x32xi1>, vector<32x32xf32>
    %cst_28 = arith.constant dense<0xFF800000> : vector<32xf32>
    %100 = vector.multi_reduction <maximumf>, %99, %cst_28 [1] : vector<32x32xf32> to vector<32xf32>
    %101 = vector.shape_cast %100 : vector<32xf32> to vector<32x1xf32>
    %102 = vector.broadcast %101 : vector<32x1xf32> to vector<32x32xf32>
    %103 = arith.subf %99, %102 : vector<32x32xf32>
    %104 = math.exp %103 : vector<32x32xf32>
    %cst_29 = arith.constant dense<0.000000e+00> : vector<32xf32>
    %105 = vector.multi_reduction <add>, %104, %cst_29 [1] : vector<32x32xf32> to vector<32xf32>
    %106 = vector.shape_cast %105 : vector<32xf32> to vector<32x1xf32>
    %107 = tpu.reciprocal %106 {approx = true} : vector<32x1xf32> -> vector<32x1xf32>
    %108 = vector.broadcast %107 : vector<32x1xf32> to vector<32x32xf32>
    %109 = arith.mulf %104, %108 : vector<32x32xf32>
    %110 = arith.truncf %109 : vector<32x32xf32> to vector<32x32xbf16>
    %cst_30 = arith.constant dense<0.000000e+00> : vector<32x32xf32>
    %111 = tpu.matmul %110, %96, %cst_30 {dimension_numbers = #tpu.dot_dimension_numbers<[1], [0], [0], [1], [0, 0, 1, 1], [], []>} : vector<32x32xbf16>, vector<32x32xbf16>, vector<32x32xf32> -> vector<32x32xf32>
    %c0_31 = arith.constant 0 : index
    %c32 = arith.constant 32 : index
    %112 = vector.load %arg12[%c0_31, %c32] : memref<32x128xf32, #tpu.memory_space<vmem>>, vector<32x32xf32>
    tpu.vector_store %arg12[%c0_31, %c32], %111 {strides = array<i32>} : memref<32x128xf32, #tpu.memory_space<vmem>>, vector<32x32xf32>,
    %113 = vector.extract_strided_slice %34 {offsets = [0, 64], sizes = [32, 32], strides = [1, 1]} : vector<32x128xbf16> to vector<32x32xbf16>
    %114 = vector.extract_strided_slice %46 {offsets = [0, 64], sizes = [32, 32], strides = [1, 1]} : vector<32x128xbf16> to vector<32x32xbf16>
    %115 = vector.extract_strided_slice %47 {offsets = [0, 64], sizes = [32, 32], strides = [1, 1]} : vector<32x128xbf16> to vector<32x32xbf16>
    %cst_32 = arith.constant dense<0.000000e+00> : vector<32x32xf32>
    %116 = tpu.matmul %113, %114, %cst_32 {dimension_numbers = #tpu.dot_dimension_numbers<[1], [1], [0], [0], [0, 0, 1, 0], [], []>} : vector<32x32xbf16>, vector<32x32xbf16>, vector<32x32xf32> -> vector<32x32xf32>
    %cst_33 = arith.constant -1.000000e+30 : f32
    %117 = vector.broadcast %cst_33 : f32 to vector<32x32xf32>
    %118 = arith.select %74, %116, %117 : vector<32x32xi1>, vector<32x32xf32>
    %cst_34 = arith.constant dense<0xFF800000> : vector<32xf32>
    %119 = vector.multi_reduction <maximumf>, %118, %cst_34 [1] : vector<32x32xf32> to vector<32xf32>
    %120 = vector.shape_cast %119 : vector<32xf32> to vector<32x1xf32>
    %121 = vector.broadcast %120 : vector<32x1xf32> to vector<32x32xf32>
    %122 = arith.subf %118, %121 : vector<32x32xf32>
    %123 = math.exp %122 : vector<32x32xf32>
    %cst_35 = arith.constant dense<0.000000e+00> : vector<32xf32>
    %124 = vector.multi_reduction <add>, %123, %cst_35 [1] : vector<32x32xf32> to vector<32xf32>
    %125 = vector.shape_cast %124 : vector<32xf32> to vector<32x1xf32>
    %126 = tpu.reciprocal %125 {approx = true} : vector<32x1xf32> -> vector<32x1xf32>
    %127 = vector.broadcast %126 : vector<32x1xf32> to vector<32x32xf32>
    %128 = arith.mulf %123, %127 : vector<32x32xf32>
    %129 = arith.truncf %128 : vector<32x32xf32> to vector<32x32xbf16>
    %cst_36 = arith.constant dense<0.000000e+00> : vector<32x32xf32>
    %130 = tpu.matmul %129, %115, %cst_36 {dimension_numbers = #tpu.dot_dimension_numbers<[1], [0], [0], [1], [0, 0, 1, 1], [], []>} : vector<32x32xbf16>, vector<32x32xbf16>, vector<32x32xf32> -> vector<32x32xf32>
    %c0_37 = arith.constant 0 : index
    %c64 = arith.constant 64 : index
    %131 = vector.load %arg12[%c0_37, %c64] : memref<32x128xf32, #tpu.memory_space<vmem>>, vector<32x32xf32>
    tpu.vector_store %arg12[%c0_37, %c64], %130 {strides = array<i32>} : memref<32x128xf32, #tpu.memory_space<vmem>>, vector<32x32xf32>,
    %132 = vector.extract_strided_slice %34 {offsets = [0, 96], sizes = [32, 32], strides = [1, 1]} : vector<32x128xbf16> to vector<32x32xbf16>
    %133 = vector.extract_strided_slice %46 {offsets = [0, 96], sizes = [32, 32], strides = [1, 1]} : vector<32x128xbf16> to vector<32x32xbf16>
    %134 = vector.extract_strided_slice %47 {offsets = [0, 96], sizes = [32, 32], strides = [1, 1]} : vector<32x128xbf16> to vector<32x32xbf16>
    %cst_38 = arith.constant dense<0.000000e+00> : vector<32x32xf32>
    %135 = tpu.matmul %132, %133, %cst_38 {dimension_numbers = #tpu.dot_dimension_numbers<[1], [1], [0], [0], [0, 0, 1, 0], [], []>} : vector<32x32xbf16>, vector<32x32xbf16>, vector<32x32xf32> -> vector<32x32xf32>
    %cst_39 = arith.constant -1.000000e+30 : f32
    %136 = vector.broadcast %cst_39 : f32 to vector<32x32xf32>
    %137 = arith.select %74, %135, %136 : vector<32x32xi1>, vector<32x32xf32>
    %cst_40 = arith.constant dense<0xFF800000> : vector<32xf32>
    %138 = vector.multi_reduction <maximumf>, %137, %cst_40 [1] : vector<32x32xf32> to vector<32xf32>
    %139 = vector.shape_cast %138 : vector<32xf32> to vector<32x1xf32>
    %140 = vector.broadcast %139 : vector<32x1xf32> to vector<32x32xf32>
    %141 = arith.subf %137, %140 : vector<32x32xf32>
    %142 = math.exp %141 : vector<32x32xf32>
    %cst_41 = arith.constant dense<0.000000e+00> : vector<32xf32>
    %143 = vector.multi_reduction <add>, %142, %cst_41 [1] : vector<32x32xf32> to vector<32xf32>
    %144 = vector.shape_cast %143 : vector<32xf32> to vector<32x1xf32>
    %145 = tpu.reciprocal %144 {approx = true} : vector<32x1xf32> -> vector<32x1xf32>
    %146 = vector.broadcast %145 : vector<32x1xf32> to vector<32x32xf32>
    %147 = arith.mulf %142, %146 : vector<32x32xf32>
    %148 = arith.truncf %147 : vector<32x32xf32> to vector<32x32xbf16>
    %cst_42 = arith.constant dense<0.000000e+00> : vector<32x32xf32>
    %149 = tpu.matmul %148, %134, %cst_42 {dimension_numbers = #tpu.dot_dimension_numbers<[1], [0], [0], [1], [0, 0, 1, 1], [], []>} : vector<32x32xbf16>, vector<32x32xbf16>, vector<32x32xf32> -> vector<32x32xf32>
    %c0_43 = arith.constant 0 : index
    %c96 = arith.constant 96 : index
    %150 = vector.load %arg12[%c0_43, %c96] : memref<32x128xf32, #tpu.memory_space<vmem>>, vector<32x32xf32>
    tpu.vector_store %arg12[%c0_43, %c96], %149 {strides = array<i32>} : memref<32x128xf32, #tpu.memory_space<vmem>>, vector<32x32xf32>,
    %c0_44 = arith.constant 0 : index
    %c0_45 = arith.constant 0 : index
    %151 = vector.load %arg12[%c0_44, %c0_45] : memref<32x128xf32, #tpu.memory_space<vmem>>, vector<32x128xf32>
    %152 = arith.truncf %151 : vector<32x128xf32> to vector<32x128xbf16>
    %c0_46 = arith.constant 0 : index
    %c0_47 = arith.constant 0 : index
    %153 = vector.load %arg7[%c0_46, %c0_47] : memref<128x128xbf16, #tpu.memory_space<vmem>>, vector<128x128xbf16>
    %cst_48 = arith.constant dense<0.000000e+00> : vector<32x128xf32>
    %154 = tpu.matmul %152, %153, %cst_48 {dimension_numbers = #tpu.dot_dimension_numbers<[1], [0], [0], [1], [0, 0, 1, 1], [], []>} : vector<32x128xbf16>, vector<128x128xbf16>, vector<32x128xf32> -> vector<32x128xf32>
    %155 = arith.addf %0, %154 : vector<32x128xf32>
    %156 = arith.mulf %155, %155 : vector<32x128xf32>
    %cst_49 = arith.constant dense<0.000000e+00> : vector<32xf32>
    %157 = vector.multi_reduction <add>, %156, %cst_49 [1] : vector<32x128xf32> to vector<32xf32>
    %158 = vector.shape_cast %157 : vector<32xf32> to vector<32x1xf32>
    %cst_50 = arith.constant 1.280000e+02 : f32
    %159 = vector.broadcast %cst_50 : f32 to vector<32x1xf32>
    %160 = arith.divf %158, %159 : vector<32x1xf32>
    %cst_51 = arith.constant 9.99999974E-6 : f32
    %161 = vector.broadcast %cst_51 : f32 to vector<32x1xf32>
    %162 = arith.addf %160, %161 : vector<32x1xf32>
    %163 = math.rsqrt %162 : vector<32x1xf32>
    %164 = vector.broadcast %163 : vector<32x1xf32> to vector<32x128xf32>
    %165 = arith.mulf %155, %164 : vector<32x128xf32>
    %c0_52 = arith.constant 0 : index
    %c0_53 = arith.constant 0 : index
    %166 = vector.load %arg8[%c0_52, %c0_53] : memref<1x128xf32, #tpu.memory_space<vmem>>, vector<1x128xf32>
    %167 = vector.broadcast %166 : vector<1x128xf32> to vector<32x128xf32>
    %168 = arith.mulf %165, %167 : vector<32x128xf32>
    %169 = arith.truncf %168 : vector<32x128xf32> to vector<32x128xbf16>
    %c0_54 = arith.constant 0 : index
    %c0_55 = arith.constant 0 : index
    %170 = vector.load %arg9[%c0_54, %c0_55] : memref<128x768xbf16, #tpu.memory_space<vmem>>, vector<128x768xbf16>
    %cst_56 = arith.constant dense<0.000000e+00> : vector<32x768xf32>
    %171 = tpu.matmul %169, %170, %cst_56 {dimension_numbers = #tpu.dot_dimension_numbers<[1], [0], [0], [1], [0, 0, 1, 1], [], []>} : vector<32x128xbf16>, vector<128x768xbf16>, vector<32x768xf32> -> vector<32x768xf32>
    %172 = vector.extract_strided_slice %171 {offsets = [0, 0], sizes = [32, 384], strides = [1, 1]} : vector<32x768xf32> to vector<32x384xf32>
    %173 = vector.extract_strided_slice %171 {offsets = [0, 384], sizes = [32, 384], strides = [1, 1]} : vector<32x768xf32> to vector<32x384xf32>
    %cst_57 = arith.constant 0.000000e+00 : f32
    %174 = vector.broadcast %cst_57 : f32 to vector<32x384xf32>
    %175 = arith.subf %174, %172 : vector<32x384xf32>
    %176 = math.exp %175 : vector<32x384xf32>
    %cst_58 = arith.constant 1.000000e+00 : f32
    %177 = vector.broadcast %cst_58 : f32 to vector<32x384xf32>
    %178 = arith.addf %177, %176 : vector<32x384xf32>
    %179 = tpu.reciprocal %178 {approx = true} : vector<32x384xf32> -> vector<32x384xf32>
    %180 = arith.mulf %172, %179 : vector<32x384xf32>
    %181 = arith.mulf %180, %173 : vector<32x384xf32>
    %182 = arith.truncf %181 : vector<32x384xf32> to vector<32x384xbf16>
    %c0_59 = arith.constant 0 : index
    %c0_60 = arith.constant 0 : index
    %183 = vector.load %arg10[%c0_59, %c0_60] : memref<384x128xbf16, #tpu.memory_space<vmem>>, vector<384x128xbf16>
    %cst_61 = arith.constant dense<0.000000e+00> : vector<32x128xf32>
    %184 = tpu.matmul %182, %183, %cst_61 {dimension_numbers = #tpu.dot_dimension_numbers<[1], [0], [0], [1], [0, 0, 1, 1], [], []>} : vector<32x384xbf16>, vector<384x128xbf16>, vector<32x128xf32> -> vector<32x128xf32>
    %185 = arith.addf %155, %184 : vector<32x128xf32>
    %c0_62 = arith.constant 0 : index
    %c0_63 = arith.constant 0 : index
    %186 = vector.load %arg11[%c0_62, %c0_63] : memref<32x128xf32, #tpu.memory_space<vmem>>, vector<32x128xf32>
    tpu.vector_store %arg11[%c0_62, %c0_63], %185 {strides = array<i32>} : memref<32x128xf32, #tpu.memory_space<vmem>>, vector<32x128xf32>,
    return
  }
  func.func @transform_0(%arg0: i32) -> (i32, i32) {
    %c0_i32 = arith.constant 0 : i32
    %c0_i32_0 = arith.constant 0 : i32
    %c0_i32_1 = arith.constant 0 : i32
    return %c0_i32, %c0_i32_0 : i32, i32
  }
  func.func @transform_1(%arg0: i32) -> (i32, i32) {
    %c0_i32 = arith.constant 0 : i32
    %c0_i32_0 = arith.constant 0 : i32
    %c0_i32_1 = arith.constant 0 : i32
    return %c0_i32, %c0_i32_0 : i32, i32
  }
  func.func @transform_2(%arg0: i32) -> (i32, i32) {
    %c0_i32 = arith.constant 0 : i32
    %c0_i32_0 = arith.constant 0 : i32
    %c0_i32_1 = arith.constant 0 : i32
    return %c0_i32, %c0_i32_0 : i32, i32
  }
  func.func @transform_3(%arg0: i32) -> (i32, i32) {
    %c0_i32 = arith.constant 0 : i32
    %c0_i32_0 = arith.constant 0 : i32
    %c0_i32_1 = arith.constant 0 : i32
    return %c0_i32, %c0_i32_0 : i32, i32
  }
  func.func @transform_4(%arg0: i32) -> (i32, i32) {
    %c0_i32 = arith.constant 0 : i32
    %c0_i32_0 = arith.constant 0 : i32
    %c0_i32_1 = arith.constant 0 : i32
    return %c0_i32, %c0_i32_0 : i32, i32
  }
  func.func @transform_5(%arg0: i32) -> (i32, i32) {
    %c0_i32 = arith.constant 0 : i32
    %c0_i32_0 = arith.constant 0 : i32
    %c0_i32_1 = arith.constant 0 : i32
    return %c0_i32, %c0_i32_0 : i32, i32
  }
  func.func @transform_6(%arg0: i32) -> (i32, i32) {
    %c0_i32 = arith.constant 0 : i32
    %c0_i32_0 = arith.constant 0 : i32
    %c0_i32_1 = arith.constant 0 : i32
    return %c0_i32, %c0_i32_0 : i32, i32
  }
  func.func @transform_7(%arg0: i32) -> (i32, i32) {
    %c0_i32 = arith.constant 0 : i32
    %c0_i32_0 = arith.constant 0 : i32
    %c0_i32_1 = arith.constant 0 : i32
    return %c0_i32, %c0_i32_0 : i32, i32
  }
  func.func @transform_8(%arg0: i32) -> (i32, i32) {
    %c0_i32 = arith.constant 0 : i32
    %c0_i32_0 = arith.constant 0 : i32
    %c0_i32_1 = arith.constant 0 : i32
    return %c0_i32, %c0_i32_0 : i32, i32
  }
  func.func @transform_9(%arg0: i32) -> (i32, i32) {
    %c0_i32 = arith.constant 0 : i32
    %c0_i32_0 = arith.constant 0 : i32
    %c0_i32_1 = arith.constant 0 : i32
    return %c0_i32, %c0_i32_0 : i32, i32
  }
  func.func @transform_10(%arg0: i32) -> (i32, i32) {
    %c0_i32 = arith.constant 0 : i32
    %c0_i32_0 = arith.constant 0 : i32
    %c0_i32_1 = arith.constant 0 : i32
    return %c0_i32, %c0_i32_0 : i32, i32
  }
}

</mosaic_0001>

<bundles_post_ra>
// kernel: tpu_custom_call.1
= control target key start
LH: loop header
LB: loop body
LE: loop exit
PB: predicated region body
PF: predicated region fallthrough
CT: control target
= control target key end

     0   :  { %15 = vsyncpa [#allocation4], 0  ;;  %s3842_s0 = inlined_call_operand.hbm [shape: f32[32,128], index: 0, kind: input, shape index: {}]   ;;  %s3843_s1 = inlined_call_operand.hbm [shape: f32[32,128], index: 1, kind: input, shape index: {}]   ;;  %s3844_s2 = inlined_call_operand.hbm [shape: f32[32,128], index: 2, kind: input, shape index: {}]   ;;  %s3845_s3 = inlined_call_operand.hbm [shape: f32[32,128], index: 3, kind: input, shape index: {}]   ;;  %s3846_s4 = inlined_call_operand.vmem [shape: f32[1,128], index: 4, kind: input, shape index: {}]   ;;  %s3847_s5 = inlined_call_operand.hbm [shape: bf16[128,384], index: 5, kind: input, shape index: {}]   ;;  %s3848_s6 = inlined_call_operand.hbm [shape: bf16[128,128], index: 6, kind: input, shape index: {}]   ;;  %s3849_s7 = inlined_call_operand.vmem [shape: f32[1,128], index: 7, kind: input, shape index: {}]   ;;  %s3850_s8 = inlined_call_operand.hbm [shape: bf16[128,768], index: 8, kind: input, shape index: {}]   ;;  %s3851_s9 = inlined_call_operand.hbm [shape: bf16[384,128], index: 9, kind: input, shape index: {}]   ;;  %s3852_s10 = inlined_call_operand.hbm [shape: f32[32,128], index: 10, kind: output, shape index: {}]  }
   0x1   :  { %16 = vsyncpa [#allocation7], 0 }
   0x2   :  { %17 = vsyncpa [#allocation10], 0 }
   0x3   :  { %18 = vsyncpa [#allocation13], 0 }
   0x4   :  { %19 = vsyncpa [#allocation16], 0 }
   0x5   :  { %20 = vsyncpa [#allocation5], 0  ;;  %s3269_s13 = smov [#allocation6]   ;;  %s3270_s15 = smov [#allocation9]  }
   0x6   :  { %s38_s14 = sshll.u32 %s3269_s13, 4  ;;  %s62_s16 = sshll.u32 %s3270_s15, 4  ;;  %s39_s14 = int_to_ptr.vmem [resolvable:$true] %s38_s14  ;;  %s3346_s16 = int_to_ptr.vmem [resolvable:$true] %s62_s16 }
   0x7   :  { %s3059_s19 = scalar_lea.hbm %s3843_s1, 512 }
   0x8   :  { %p3060_p0 = scmp.ne.s32.totalorder %s3843_s1, %s3059_s19  ;;  %p3063_p1 = scmp.lt.u32.totalorder %s3059_s19, %s3843_s1 }
   0xa   :  { %p3065_p2 = pnand %p3063_p1, %p3060_p0 }
   0xc   :  { %3068 = shalt.err (!%p3065_p2)
}
   0xd   :  { %s3069_s24 = scalar_lea.vmem %s39_s14, 512  ;;  %p3074_p4 = scmp.lt.s32.totalorder %s39_s14, %s39_s14 }
   0xe   :  { %p3070_p3 = scmp.ne.s32.totalorder %s39_s14, %s3069_s24  ;;  %p3075_p5 = scmp.lt.s32.totalorder %s3069_s24, %s3069_s24 }
  0x10   :  { %p3076_p6 = por %p3075_p5, %p3074_p4 }
  0x12   :  { %p3077_p7 = pnand %p3076_p6, %p3070_p3 }
  0x14   :  { %3080 = shalt.err (!%p3077_p7)
}
  0x15   :  { %s3271_s25 = smov 128   ;;  %s3272_s26 = smov 8  }
  0x16   :  { %44 = dma.hbm_to_vmem [thread:$0]  %s3843_s1, 512, %s39_s14, [#allocation7], %s3271_s25, %s3271_s25, %s3272_s26  }
  0x17   :  { %s3081_s11 = scalar_lea.hbm %s3845_s3, 512 }
  0x18   :  { %p3082_p8 = scmp.ne.s32.totalorder %s3845_s3, %s3081_s11  ;;  %p3085_p9 = scmp.lt.u32.totalorder %s3081_s11, %s3845_s3 }
  0x1a   :  { %p3087_p10 = pnand %p3085_p9, %p3082_p8 }
  0x1c   :  { %3090 = shalt.err (!%p3087_p10)
}
  0x1d   :  { %s3091_s18 = scalar_lea.vmem %s3346_s16, 512  ;;  %p3096_p12 = scmp.lt.s32.totalorder %s3346_s16, %s3346_s16 }
  0x1e   :  { %p3092_p11 = scmp.ne.s32.totalorder %s3346_s16, %s3091_s18  ;;  %p3097_p13 = scmp.lt.s32.totalorder %s3091_s18, %s3091_s18 }
  0x20   :  { %p3098_p0 = por %p3097_p13, %p3096_p12 }
  0x22   :  { %p3099_p1 = pnand %p3098_p0, %p3092_p11 }
  0x24   :  { %3102 = shalt.err (!%p3099_p1)
}
  0x25   :  { %68 = dma.hbm_to_vmem [thread:$0]  %s3845_s3, 512, %s3346_s16, [#allocation10], %s3271_s25, %s3271_s25, %s3272_s26  }
  0x26   :  { %s3273_s19 = smov [#allocation12]   ;;  %s3103_s23 = scalar_lea.hbm %s3848_s6, 1024 }
  0x27   :  { %s88_s20 = sshll.u32 %s3273_s19, 4  ;;  %p3104_p2 = scmp.ne.s32.totalorder %s3848_s6, %s3103_s23  ;;  %s89_s20 = int_to_ptr.vmem [resolvable:$true] %s88_s20 }
  0x28   :  { %p3107_p3 = scmp.lt.u32.totalorder %s3103_s23, %s3848_s6 }
  0x2a   :  { %p3109_p4 = pnand %p3107_p3, %p3104_p2 }
  0x2c   :  { %3112 = shalt.err (!%p3109_p4)
}
  0x2d   :  { %s3113_s30 = scalar_lea.vmem %s89_s20, 1024  ;;  %p3118_p6 = scmp.lt.s32.totalorder %s89_s20, %s89_s20 }
  0x2e   :  { %p3114_p5 = scmp.ne.s32.totalorder %s89_s20, %s3113_s30  ;;  %p3119_p7 = scmp.lt.s32.totalorder %s3113_s30, %s3113_s30 }
  0x30   :  { %p3120_p8 = por %p3119_p7, %p3118_p6 }
  0x32   :  { %p3121_p9 = pnand %p3120_p8, %p3114_p5 }
  0x34   :  { %3124 = shalt.err (!%p3121_p9)
}
  0x35   :  { %s3274_s3 = smov 64   ;;  %s3275_s16 = smov 4  }
  0x36   :  { %94 = dma.hbm_to_vmem [thread:$0]  %s3848_s6, 1024, %s89_s20, [#allocation13], %s3274_s3, %s3274_s3, %s3275_s16  }
  0x37   :  { %s3276_s13 = smov [#allocation3]   ;;  %s3277_s17 = smov [#allocation8]  }
  0x38   :  { %s26_s15 = sshll.u32 %s3276_s13, 4  ;;  %s50_s18 = sshll.u32 %s3277_s17, 4  ;;  %s27_s15 = int_to_ptr.vmem [resolvable:$true] %s26_s15  ;;  %s51_s18 = int_to_ptr.vmem [resolvable:$true] %s50_s18 }
  0x39   :  { %s3125_s19 = scalar_lea.hbm %s3842_s0, 512 }
  0x3a   :  { %p3126_p10 = scmp.ne.s32.totalorder %s3842_s0, %s3125_s19  ;;  %p3129_p11 = scmp.lt.u32.totalorder %s3125_s19, %s3842_s0 }
  0x3c   :  { %p3131_p12 = pnand %p3129_p11, %p3126_p10 }
  0x3e   :  { %3134 = shalt.err (!%p3131_p12)
}
  0x3f   :  { %s3135_s6 = scalar_lea.vmem %s27_s15, 512  ;;  %p3140_p0 = scmp.lt.s32.totalorder %s27_s15, %s27_s15 }
  0x40   :  { %p3136_p13 = scmp.ne.s32.totalorder %s27_s15, %s3135_s6  ;;  %p3141_p1 = scmp.lt.s32.totalorder %s3135_s6, %s3135_s6 }
  0x42   :  { %p3142_p2 = por %p3141_p1, %p3140_p0 }
  0x44   :  { %p3143_p3 = pnand %p3142_p2, %p3136_p13 }
  0x46   :  { %3146 = shalt.err (!%p3143_p3)
}
  0x47   :  { %32 = dma.hbm_to_vmem [thread:$0]  %s3842_s0, 512, %s27_s15, [#allocation4], %s3271_s25, %s3271_s25, %s3272_s26  }
  0x48   :  { %s3147_s30 = scalar_lea.hbm %s3844_s2, 512 }
  0x49   :  { %p3148_p4 = scmp.ne.s32.totalorder %s3844_s2, %s3147_s30  ;;  %p3151_p5 = scmp.lt.u32.totalorder %s3147_s30, %s3844_s2 }
  0x4b   :  { %p3153_p6 = pnand %p3151_p5, %p3148_p4 }
  0x4d   :  { %3156 = shalt.err (!%p3153_p6)
}
  0x4e   :  { %s3157_s1 = scalar_lea.vmem %s51_s18, 512  ;;  %p3162_p8 = scmp.lt.s32.totalorder %s51_s18, %s51_s18 }
  0x4f   :  { %p3158_p7 = scmp.ne.s32.totalorder %s51_s18, %s3157_s1  ;;  %p3163_p9 = scmp.lt.s32.totalorder %s3157_s1, %s3157_s1 }
  0x51   :  { %p3164_p10 = por %p3163_p9, %p3162_p8 }
  0x53   :  { %p3165_p11 = pnand %p3164_p10, %p3158_p7 }
  0x55   :  { %3168 = shalt.err (!%p3165_p11)
}
  0x56   :  { %56 = dma.hbm_to_vmem [thread:$0]  %s3844_s2, 512, %s51_s18, [#allocation7], %s3271_s25, %s3271_s25, %s3272_s26  }
  0x57   :  { %s3278_s14 = smov [#allocation11]   ;;  %s3169_s23 = scalar_lea.hbm %s3847_s5, 3072 }
  0x58   :  { %s76_s19 = sshll.u32 %s3278_s14, 4  ;;  %p3170_p12 = scmp.ne.s32.totalorder %s3847_s5, %s3169_s23  ;;  %s77_s19 = int_to_ptr.vmem [resolvable:$true] %s76_s19 }
  0x59   :  { %p3173_p13 = scmp.lt.u32.totalorder %s3169_s23, %s3847_s5 }
  0x5b   :  { %p3175_p0 = pnand %p3173_p13, %p3170_p12 }
  0x5d   :  { %3178 = shalt.err (!%p3175_p0)
}
  0x5e   :  { %s3179_s28 = scalar_lea.vmem %s77_s19, 3072  ;;  %p3184_p2 = scmp.lt.s32.totalorder %s77_s19, %s77_s19 }
  0x5f   :  { %p3180_p1 = scmp.ne.s32.totalorder %s77_s19, %s3179_s28  ;;  %p3185_p3 = scmp.lt.s32.totalorder %s3179_s28, %s3179_s28 }
  0x61   :  { %p3186_p4 = por %p3185_p3, %p3184_p2 }
  0x63   :  { %p3187_p5 = pnand %p3186_p4, %p3180_p1 }
  0x65   :  { %3190 = shalt.err (!%p3187_p5)
}
  0x66   :  { %s3279_s2 = smov 192   ;;  %s3280_s18 = smov 12  }
  0x67   :  { %82 = dma.hbm_to_vmem [thread:$0]  %s3847_s5, 3072, %s77_s19, [#allocation10], %s3279_s2, %s3279_s2, %s3280_s18  }
  0x68   :  { %s3281_s11 = smov [#allocation14]   ;;  %s3191_s1 = scalar_lea.hbm %s3850_s8, 6144 }
  0x69   :  { %s102_s12 = sshll.u32 %s3281_s11, 4  ;;  %p3192_p6 = scmp.ne.s32.totalorder %s3850_s8, %s3191_s1  ;;  %s103_s12 = int_to_ptr.vmem [resolvable:$true] %s102_s12 }
  0x6a   :  { %p3195_p7 = scmp.lt.u32.totalorder %s3191_s1, %s3850_s8 }
  0x6c   :  { %p3197_p8 = pnand %p3195_p7, %p3192_p6 }
  0x6e   :  { %3200 = shalt.err (!%p3197_p8)
}
  0x6f   :  { %s3201_s22 = scalar_lea.vmem %s103_s12, 6144  ;;  %p3206_p10 = scmp.lt.s32.totalorder %s103_s12, %s103_s12 }
  0x70   :  { %p3202_p9 = scmp.ne.s32.totalorder %s103_s12, %s3201_s22  ;;  %p3207_p11 = scmp.lt.s32.totalorder %s3201_s22, %s3201_s22 }
  0x72   :  { %p3208_p12 = por %p3207_p11, %p3206_p10 }
  0x74   :  { %p3209_p13 = pnand %p3208_p12, %p3202_p9 }
  0x76   :  { %3212 = shalt.err (!%p3209_p13)
}
  0x77   :  { %s3282_s5 = smov 384   ;;  %s3283_s19 = smov 24  }
  0x78   :  { %108 = dma.hbm_to_vmem [thread:$0]  %s3850_s8, 6144, %s103_s12, [#allocation13], %s3282_s5, %s3282_s5, %s3283_s19  }
  0x79   :  { %s3284_s6 = smov [#allocation15]   ;;  %s3213_s2 = scalar_lea.hbm %s3851_s9, 3072 }
  0x7a   :  { %s114_s20 = sshll.u32 %s3284_s6, 4  ;;  %p3214_p0 = scmp.ne.s32.totalorder %s3851_s9, %s3213_s2  ;;  %s115_s20 = int_to_ptr.vmem [resolvable:$true] %s114_s20 }
  0x7b   :  { %p3217_p1 = scmp.lt.u32.totalorder %s3213_s2, %s3851_s9 }
  0x7d   :  { %p3219_p2 = pnand %p3217_p1, %p3214_p0 }
  0x7f   :  { %3222 = shalt.err (!%p3219_p2)
}
  0x80   :  { %s3223_s13 = scalar_lea.vmem %s115_s20, 3072  ;;  %p3228_p4 = scmp.lt.s32.totalorder %s115_s20, %s115_s20 }
  0x81   :  { %p3224_p3 = scmp.ne.s32.totalorder %s115_s20, %s3223_s13  ;;  %p3229_p5 = scmp.lt.s32.totalorder %s3223_s13, %s3223_s13 }
  0x83   :  { %p3230_p6 = por %p3229_p5, %p3228_p4 }
  0x85   :  { %p3231_p7 = pnand %p3230_p6, %p3224_p3 }
  0x87   :  { %3234 = shalt.err (!%p3231_p7)
}
  0x88   :  { %120 = dma.hbm_to_vmem [thread:$0]  %s3851_s9, 3072, %s115_s20, [#allocation16], %s3274_s3, %s3274_s3, %s3275_s16  }
  0x89   :  { %3257 = dma.done.wait [#allocation4], 512  }
  0x8a   :  { %3258 = vsyncadd [#allocation4], 4294966784 }
  0x8b   :  { %3259 = dma.done.wait [#allocation7], 1024  }
  0x8c   :  { %3260 = vsyncadd [#allocation7], 4294966272 }
  0x8d   :  { %3261 = dma.done.wait [#allocation10], 3584  }
  0x8e   :  { %3262 = vsyncadd [#allocation10], 4294963712 }
  0x8f   :  { %3263 = dma.done.wait [#allocation13], 7168  }
  0x90   :  { %3264 = vsyncadd [#allocation13], 4294960128 }
  0x91   :  { %3265 = dma.done.wait [#allocation16], 3072  }
  0x92   :  { %3266 = vsyncadd [#allocation16], 4294964224  ;;  %v3467_v0 = vld [vmem:[#allocation3] sm:$0xff]  ;;  %v3469_v1 = vld [vmem:[#allocation3 + $0x10] sm:$0xff]  ;;  %v3285_v30 = vmov 0   ;;  %s3287_s17 = smov 112  }
  0x93   :  { %v3471_v2 = vld [vmem:[#allocation3 + $0x8] sm:$0xff]  ;;  %v150_v3 = vmul.f32 %v3467_v0, %v3467_v0  ;;  %v152_v4 = vmul.f32 %v3469_v1, %v3469_v1  ;;  %v3477_v5 = vld [vmem:[#allocation3 + $0x18] sm:$0xff]  ;;  %v2791_v6 = vld [vmem:[#allocation11 + $0x4] ss:$12 sps:$4 sm:$0xff]   ;;  %384 = vmatprep.mubr.bf16.mxu0 %v3285_v30  ;;  %vm625_vm0 = vcmask 261120   ;;  %s3288_s1 = smov 96  }
  0x94   :  { %v2793_v7 = vld [vmem:[#allocation11] ss:$12 sps:$4 sm:$0xff]   ;;  %v151_v8 = vmul.f32 %v3471_v2, %v3471_v2  ;;  %v153_v9 = vmul.f32 %v3477_v5, %v3477_v5  ;;  %v2794_v10 = vld [vmem:[#allocation11 + $0x8] ss:$12 sps:$4 sm:$0xff]   ;;  %352 = vmatprep.subr.bf16.mxu0 %v2791_v6  ;;  %v2797_v12 = vld [vmem:[#allocation11 + $0x18] ss:$12 sps:$4 sm:$0xff]  }
  0x95   :  { %154 = vadd.xlane.f32.xlu0 %v150_v3  ;;  %158 = vadd.xlane.f32.xlu1 %v152_v4  ;;  %v2795_v11 = vld [vmem:[#allocation11 + $0x1c] ss:$12 sps:$4 sm:$0xff]   ;;  %v2798_v13 = vld [vmem:[#allocation11 + $0x20] ss:$12 sps:$4 sm:$0xff]   ;;  %v2802_v16 = vld [vmem:[#allocation11 + $0x38] ss:$12 sps:$4 sm:$0xff]  }
  0x96   :  { %353 = vmatpush1.bf16.msra.mxu0 %v2793_v7  ;;  %2637 = vmatprep.subr.bf16.mxu1 %v2794_v10  ;;  %v2799_v14 = vld [vmem:[#allocation11 + $0x34] ss:$12 sps:$4 sm:$0xff]   ;;  %v2801_v15 = vld [vmem:[#allocation11 + $0x30] ss:$12 sps:$4 sm:$0xff]   ;;  %v2803_v17 = vld [vmem:[#allocation11 + $0x4c] ss:$12 sps:$4 sm:$0xff]  }
  0x97   :  { %354 = vmatprep.subr.bf16.mxu0 %v2795_v11  ;;  %2638 = vmatpush3.bf16.msra.mxu1 %v2794_v10  ;;  %v2805_v18 = vld [vmem:[#allocation11 + $0x48] ss:$12 sps:$4 sm:$0xff]   ;;  %v2806_v19 = vld [vmem:[#allocation11 + $0x50] ss:$12 sps:$4 sm:$0xff]   ;;  %v2809_v21 = vld [vmem:[#allocation11 + $0x60] ss:$12 sps:$4 sm:$0xff]  }
  0x98   :  { %2639 = vmatprep.subr.bf16.mxu1 %v2798_v13  ;;  %v2807_v20 = vld [vmem:[#allocation11 + $0x64] ss:$12 sps:$4 sm:$0xff]   ;;  %v2810_v22 = vld [vmem:[#allocation11 + $0x68] ss:$12 sps:$4 sm:$0xff]   ;;  %v2814_v25 = vld [vmem:[#allocation11 + $0x80] ss:$12 sps:$4 sm:$0xff]  }
  0x99   :  { %156 = vadd.xlane.f32.xlu0 %v151_v8  ;;  %160 = vadd.xlane.f32.xlu1 %v153_v9  ;;  %v2811_v23 = vld [vmem:[#allocation11 + $0x7c] ss:$12 sps:$4 sm:$0xff]   ;;  %v2813_v24 = vld [vmem:[#allocation11 + $0x78] ss:$12 sps:$4 sm:$0xff]   ;;  %v2815_v26 = vld [vmem:[#allocation11 + $0x94] ss:$12 sps:$4 sm:$0xff]  }
  0x9a   :  { %355 = vmatpush1.bf16.msra.mxu0 %v2797_v12  ;;  %v2817_v27 = vld [vmem:[#allocation11 + $0x90] ss:$12 sps:$4 sm:$0xff]   ;;  %v2818_v28 = vld [vmem:[#allocation11 + $0x98] ss:$12 sps:$4 sm:$0xff]   ;;  %v2821_v31 = vld [vmem:[#allocation11 + $0xa8] ss:$12 sps:$4 sm:$0xff]  }
  0x9b   :  { %356 = vmatprep.subr.bf16.mxu0 %v2799_v14  ;;  %2640 = vmatpush3.bf16.msra.mxu1 %v2798_v13  ;;  %v2819_v29 = vld [vmem:[#allocation11 + $0xac] ss:$12 sps:$4 sm:$0xff]   ;;  %v2822_v32 = vld [vmem:[#allocation11 + $0xb0] ss:$12 sps:$4 sm:$0xff]   ;;  %v2425_v50 = vld [vmem:[%s3846_s4] ss:$0 sm:$0xff] }
  0x9c   :  { %2641 = vmatprep.subr.bf16.mxu1 %v2802_v16  ;;  %s3286_s4 = smov 16   ;;  %v454_v14 = vld [vmem:[#allocation6] sm:$0xff]  ;;  %s3289_s0 = smov 32   ;;  %vm998_vm13 = vcmask 523520   ;;  %vm1199_vm14 = vcmask 785920   ;;  %vm1400_vm15 = vcmask 1048320  }
  0x9e   :  { %357 = vmatpush1.bf16.msra.mxu0 %v2801_v15  ;;  %v458_v15 = vld [vmem:[#allocation8] sm:$0xff] }
  0x9f   :  { %358 = vmatprep.subr.bf16.mxu0 %v2803_v17  ;;  %2642 = vmatpush3.bf16.msra.mxu1 %v2802_v16 }
  0xa0   :  { %2643 = vmatprep.subr.bf16.mxu1 %v2806_v19 }
  0xa2   :  { %359 = vmatpush1.bf16.msra.mxu0 %v2805_v18  ;;  %v455_v18 = vld [vmem:[#allocation6 + $0x8] sm:$0xff] }
  0xa3   :  { %360 = vmatprep.subr.bf16.mxu0 %v2807_v20  ;;  %2644 = vmatpush3.bf16.msra.mxu1 %v2806_v19  ;;  %v459_v19 = vld [vmem:[#allocation8 + $0x8] sm:$0xff] }
  0xa4   :  { %2645 = vmatprep.subr.bf16.mxu1 %v2810_v22 }
  0xa6   :  { %361 = vmatpush1.bf16.msra.mxu0 %v2809_v21 }
  0xa7   :  { %362 = vmatprep.subr.bf16.mxu0 %v2811_v23  ;;  %2646 = vmatpush3.bf16.msra.mxu1 %v2810_v22  ;;  %v462_v23 = vld [vmem:[#allocation9] sm:$0xff] }
  0xa8   :  { %2647 = vmatprep.subr.bf16.mxu1 %v2814_v25 }
  0xaa   :  { %363 = vmatpush1.bf16.msra.mxu0 %v2813_v24  ;;  %v463_v24 = vld [vmem:[#allocation9 + $0x8] sm:$0xff] }
  0xab   :  { %364 = vmatprep.subr.bf16.mxu0 %v2815_v26  ;;  %2648 = vmatpush3.bf16.msra.mxu1 %v2814_v25 }
  0xac   :  { %2649 = vmatprep.subr.bf16.mxu1 %v2818_v28 }
  0xae   :  { %365 = vmatpush1.bf16.msra.mxu0 %v2817_v27 }
  0xaf   :  { %366 = vmatprep.subr.bf16.mxu0 %v2819_v29  ;;  %2650 = vmatpush3.bf16.msra.mxu1 %v2818_v28 }
  0xb0   :  { %2651 = vmatprep.subr.bf16.mxu1 %v2822_v32 }
  0xb2   :  { %367 = vmatpush1.bf16.msra.mxu0 %v2821_v31 }
  0xb3   :  { %2652 = vmatpush3.bf16.msra.mxu1 %v2822_v32 }
 0x122   :  { %v155_v33 = vpop.xlane.xlu0 %154  ;;  %v159_v34 = vpop.xlane.xlu1 %158 }
 0x123   :  { %v163_v35 = vmul.f32 0.0078125, %v155_v33  ;;  %v165_v36 = vmul.f32 0.0078125, %v159_v34 }
 0x125   :  { %v167_v37 = vadd.f32 1e-05, %v163_v35  ;;  %v169_v38 = vadd.f32 1e-05, %v165_v36 }
 0x126   :  { %v157_v39 = vpop.xlane.xlu0 %156  ;;  %v161_v40 = vpop.xlane.xlu1 %160 }
 0x127   :  { %2927 = vrsqrt.f32 %v167_v37  ;;  %v164_v41 = vmul.f32 0.0078125, %v157_v39  ;;  %v166_v42 = vmul.f32 0.0078125, %v161_v40  ;;  %v457_v39 = vld [vmem:[#allocation6 + $0x18] sm:$0xff] }
 0x128   :  { %2929 = vrsqrt.f32 %v169_v38  ;;  %v456_v38 = vld [vmem:[#allocation6 + $0x10] sm:$0xff] }
 0x129   :  { %v168_v43 = vadd.f32 1e-05, %v164_v41  ;;  %v170_v44 = vadd.f32 1e-05, %v166_v42  ;;  %v460_v41 = vld [vmem:[#allocation8 + $0x10] sm:$0xff] }
 0x12a   :  { %v464_v42 = vld [vmem:[#allocation9 + $0x10] sm:$0xff] }
 0x12b   :  { %2931 = vrsqrt.f32 %v168_v43  ;;  %v461_v43 = vld [vmem:[#allocation8 + $0x18] sm:$0xff] }
 0x12c   :  { %2933 = vrsqrt.f32 %v170_v44 }
 0x131   :  { %v2928_v45 = vpop.eup %2927 }
 0x132   :  { %v2930_v46 = vpop.eup %2929  ;;  %v175_v48 = vmul.f32 %v2928_v45, %v3467_v0 }
 0x133   :  { %v177_v47 = vmul.f32 %v2930_v46, %v3469_v1 }
 0x134   :  { %v186_v55 = vmul.f32 %v2425_v50, %v175_v48  ;;  %v465_v48 = vld [vmem:[#allocation9 + $0x18] sm:$0xff] }
 0x135   :  { %v2932_v49 = vpop.eup %2931  ;;  %v188_v54 = vmul.f32 %v2425_v50, %v177_v47 }
 0x136   :  { %v2934_v51 = vpop.eup %2933  ;;  %v176_v52 = vmul.f32 %v2932_v49, %v3471_v2 }
 0x137   :  { %v178_v53 = vmul.f32 %v2934_v51, %v3477_v5 }
 0x138   :  { %v187_v56 = vmul.f32 %v2425_v50, %v176_v52 }
 0x139   :  { %v189_v57 = vmul.f32 %v2425_v50, %v178_v53 }
 0x13a   :  { %v190_v58 = vpack.c.bf16 %v187_v56, %v186_v55 }
 0x13b   :  { %v191_v59 = vpack.c.bf16 %v189_v57, %v188_v54 }
 0x13c   :  { %385 = vmatmul.mubr.bf16.vlgmr.msra.gmra.mrb[0].mxu0 %v190_v58  ;;  %2653 = vmatprep.mubr.bf16.mxu1 %v190_v58 }
 0x13d   :  { %2654 = vmatmul.mubr.bf16.vlgmr.msra.gmra.mrb[0].mxu1 %v191_v59  ;;  %394 = vmatprep.mubr.bf16.mxu0 %v3285_v30 }
 0x144   :  { %395 = vmatmul.mubr.bf16.gmra.mrb[4].mxu0 %v191_v59 }
 0x20f   :  { %v3492_v60 = vpop.f32.mrb[0].mxu0 }
 0x210   :  { %474 = vrot.lane.b32.xlu0 %v3492_v60, %s3286_s4  ;;  %v388_v61 = vpop.f32.mrb[1].mxu0  ;;  %v2655_v62 = vpop.f32.mrb[0].mxu1  ;;  %v466_v58 = vmul.f32 %v454_v14, %v3492_v60 }
 0x211   :  { %544 = vrot.lane.b32.xlu1 %v388_v61, %s3287_s17  ;;  %v3496_v63 = vpop.f32.mrb[2].mxu0  ;;  %v439_v0 = vpop.f32.mrb[1].mxu1  ;;  %v516_v21 = vmul.f32 %v454_v14, %v388_v61 }
 0x212   :  { %v392_v1 = vpop.f32.mrb[3].mxu0  ;;  %v2656_v2 = vpop.f32.mrb[2].mxu1  ;;  %v467_v59 = vmul.f32 %v455_v18, %v3496_v63 }
 0x213   :  { %v3498_v3 = vpack.c.bf16 %v2656_v2, %v2655_v62  ;;  %v442_v4 = vpop.f32.mrb[3].mxu1  ;;  %v517_v25 = vmul.f32 %v455_v18, %v392_v1 }
 0x214   :  { %524 = vrot.lane.b32.xlu0 %v388_v61, %s3286_s4  ;;  %v3501_v5 = vpack.c.bf16 %v442_v4, %v439_v0 }
 0x215   :  { %476 = vrot.lane.b32.xlu1 %v3496_v63, %s3286_s4 }
 0x216   :  { %2665 = vmatprep.subr.bf16.mxu1 %v3501_v5 }
 0x217   :  { %v3506_v6 = vpop.f32.mrb[4].mxu0  ;;  %2666 = vmatpush3.bf16.msra.mxu1 %v3501_v5 }
 0x218   :  { %478 = vrot.lane.b32.xlu0 %v3506_v6, %s3286_s4  ;;  %v398_v7 = vpop.f32.mrb[5].mxu0  ;;  %2667 = vmatprep.subr.bf16.mxu1 %v3498_v3 }
 0x219   :  { %526 = vrot.lane.b32.xlu1 %v392_v1, %s3286_s4  ;;  %v3513_v8 = vpop.f32.mrb[6].mxu0  ;;  %v518_v49 = vmul.f32 %v456_v38, %v398_v7 }
 0x21a   :  { %v402_v9 = vpop.f32.mrb[7].mxu0 }
 0x21b   :  { %2668 = vmatpush3.bf16.msra.mxu1 %v3498_v3  ;;  %v519_v50 = vmul.f32 %v457_v39, %v402_v9 }
 0x21c   :  { %528 = vrot.lane.b32.xlu0 %v398_v7, %s3286_s4 }
 0x21d   :  { %546 = vrot.lane.b32.xlu1 %v392_v1, %s3287_s17 }
 0x220   :  { %548 = vrot.lane.b32.xlu0 %v398_v7, %s3287_s17 }
 0x221   :  { %480 = vrot.lane.b32.xlu1 %v3513_v8, %s3286_s4 }
 0x224   :  { %494 = vrot.lane.b32.xlu0 %v3492_v60, %s3287_s17 }
 0x225   :  { %530 = vrot.lane.b32.xlu1 %v402_v9, %s3286_s4 }
 0x228   :  { %498 = vrot.lane.b32.xlu0 %v3506_v6, %s3287_s17 }
 0x229   :  { %550 = vrot.lane.b32.xlu1 %v402_v9, %s3287_s17 }
 0x22d   :  { %496 = vrot.lane.b32.xlu1 %v3496_v63, %s3287_s17 }
 0x231   :  { %500 = vrot.lane.b32.xlu1 %v3513_v8, %s3287_s17 }
 0x282   :  { %v475_v10 = vpop.permute.xlu0 %474 }
 0x283   :  { %v545_v11 = vpop.permute.xlu1 %544  ;;  %v486_v52 = vmul.f32 %v475_v10, %v458_v15 }
 0x284   :  { %v556_v29 = vmul.f32 %v545_v11, %v462_v23 }
 0x285   :  { %v490_v1 = vadd.f32 %v486_v52, %v466_v58 }
 0x286   :  { %v525_v12 = vpop.permute.xlu0 %524 }
 0x287   :  { %v477_v13 = vpop.permute.xlu1 %476  ;;  %v536_v16 = vmul.f32 %v525_v12, %v458_v15  ;;  %v469_v15 = vmul.f32 %v457_v39, %v3513_v8 }
 0x288   :  { %v487_v53 = vmul.f32 %v477_v13, %v459_v19  ;;  %v468_v13 = vmul.f32 %v456_v38, %v3506_v6 }
 0x289   :  { %v540_v26 = vadd.f32 %v536_v16, %v516_v21 }
 0x28a   :  { %v479_v17 = vpop.permute.xlu0 %478  ;;  %v491_v2 = vadd.f32 %v487_v53, %v467_v59 }
 0x28b   :  { %v527_v20 = vpop.permute.xlu1 %526  ;;  %v560_v33 = vadd.f32 %v556_v29, %v540_v26  ;;  %v488_v7 = vmul.f32 %v479_v17, %v460_v41 }
 0x28c   :  { %v537_v22 = vmul.f32 %v527_v20, %v459_v19 }
 0x28d   :  { %v492_v17 = vadd.f32 %v488_v7, %v468_v13 }
 0x28e   :  { %v529_v27 = vpop.permute.xlu0 %528  ;;  %v541_v31 = vadd.f32 %v537_v22, %v517_v25 }
 0x28f   :  { %v547_v28 = vpop.permute.xlu1 %546  ;;  %v538_v45 = vmul.f32 %v529_v27, %v460_v41 }
 0x290   :  { %v557_v32 = vmul.f32 %v547_v28, %v463_v24 }
 0x291   :  { %v542_v55 = vadd.f32 %v538_v45, %v518_v49 }
 0x292   :  { %v561_v34 = vadd.f32 %v557_v32, %v541_v31  ;;  %v549_v35 = vpop.permute.xlu0 %548 }
 0x293   :  { %v481_v36 = vpop.permute.xlu1 %480  ;;  %v558_v51 = vmul.f32 %v549_v35, %v464_v42 }
 0x294   :  { %v3524_v37 = vpack.c.bf16 %v561_v34, %v560_v33  ;;  %v489_v9 = vmul.f32 %v481_v36, %v461_v43 }
 0x295   :  { %v562_v61 = vadd.f32 %v558_v51, %v542_v55 }
 0x296   :  { %2761 = vmatprep.subr.msk.bf16.mxu0 %vm625_vm0, %v3524_v37  ;;  %v633_v40 = vsel %vm625_vm0, %v3524_v37, 0  ;;  %v495_v47 = vpop.permute.xlu0 %494  ;;  %v493_v19 = vadd.f32 %v489_v9, %v469_v15 }
 0x297   :  { %2658 = vmatpush3.bf16.xpose.msra.mxu0 %v633_v40  ;;  %v531_v44 = vpop.permute.xlu1 %530  ;;  %v506_v62 = vmul.f32 %v495_v47, %v462_v23  ;;  %v568_v23 = vlaneseq }
 0x298   :  { %v539_v46 = vmul.f32 %v531_v44, %v461_v43 }
 0x299   :  { %v510_v16 = vadd.f32 %v506_v62, %v490_v1  ;;  %v574_v25 = vand.u32 127, %v568_v23 }
 0x29a   :  { %v543_v56 = vadd.f32 %v539_v46, %v519_v50  ;;  %v499_v4 = vpop.permute.xlu0 %498 }
 0x29b   :  { %v551_v54 = vpop.permute.xlu1 %550  ;;  %v508_v60 = vmul.f32 %v499_v4, %v464_v42  ;;  %vm606_vm1 = vcmp.ge.s32.totalorder %v574_v25, 16  ;;  %vm607_vm2 = vcmp.lt.s32.totalorder %v574_v25, 32  ;;  %vm588_vm3 = vcmp.lt.s32.totalorder %v574_v25, 16 }
 0x29c   :  { %v559_v57 = vmul.f32 %v551_v54, %v465_v48  ;;  %vm3548_vm5 = vmand %vm606_vm1, %vm607_vm2 }
 0x29d   :  { %v512_v22 = vadd.f32 %v508_v60, %v492_v17 }
 0x29e   :  { %v563_v0 = vadd.f32 %v559_v57, %v543_v56 }
 0x29f   :  { %v497_v11 = vpop.permute.xlu1 %496 }
 0x2a0   :  { %v3532_v12 = vpack.c.bf16 %v563_v0, %v562_v61  ;;  %v507_v10 = vmul.f32 %v497_v11, %v463_v24  ;;  %v569_v24 = vshrl.u32 %v568_v23, 7 }
 0x2a2   :  { %v511_v14 = vadd.f32 %v507_v10, %v491_v2  ;;  %2762 = vmatprep.subr.msk.bf16.mxu0 %vm625_vm0, %v3532_v12  ;;  %v636_v63 = vsel %vm625_vm0, %v3532_v12, 0  ;;  %v571_v26 = vadd.s32 16, %v569_v24  ;;  %v570_v27 = vadd.s32 8, %v569_v24 }
 0x2a3   :  { %v501_v18 = vpop.permute.xlu1 %500  ;;  %2660 = vmatpush3.bf16.xpose.msra.mxu0 %v636_v63  ;;  %vm617_vm4 = vcmp.le.s32.totalorder %v574_v25, %v569_v24  ;;  %v572_v29 = vadd.s32 24, %v569_v24 }
 0x2a4   :  { %v3540_v20 = vpack.c.bf16 %v511_v14, %v510_v16  ;;  %v509_v21 = vmul.f32 %v501_v18, %v465_v48  ;;  %vm619_vm6 = vcmp.le.s32.totalorder %v574_v25, %v571_v26  ;;  %vm618_vm7 = vcmp.le.s32.totalorder %v574_v25, %v570_v27  ;;  %vm3552_vm8 = vmand %vm617_vm4, %vm588_vm3 }
 0x2a5   :  { %vm3558_vm9 = vmand %vm619_vm6, %vm3548_vm5  ;;  %vm620_vm11 = vcmp.le.s32.totalorder %v574_v25, %v572_v29 }
 0x2a6   :  { %v513_v6 = vadd.f32 %v509_v21, %v493_v19  ;;  %2661 = vmatprep.mubr.msk.bf16.mxu0 %vm625_vm0, %v3540_v20  ;;  %vm3562_vm10 = vmand %vm618_vm7, %vm588_vm3 }
 0x2a7   :  { %vm3575_vm12 = vmand %vm620_vm11, %vm3548_vm5 }
 0x2a8   :  { %v3544_v8 = vpack.c.bf16 %v513_v6, %v512_v22 }
 0x2aa   :  { %2662 = vmatmul.mubr.msk.bf16.vlgmr.msra.gmra.mrb[8].mxu0 %vm625_vm0, %v3544_v8 }
 0x37d   :  { %v2663_v33 = vpop.f32.mrb[8].mxu0 }
 0x37e   :  { %v672_v34 = vpop.f32.mrb[9].mxu0  ;;  %v689_v41 = vsel %vm3558_vm9, %v2663_v33, -1e+30 }
 0x37f   :  { %v687_v36 = vsel %vm3552_vm8, %v672_v34, -1e+30  ;;  %v2664_v38 = vpop.f32.mrb[10].mxu0  ;;  %v697_v45 = vsel %vm625_vm0, %v689_v41, -inf }
 0x380   :  { %v675_v39 = vpop.f32.mrb[11].mxu0  ;;  %v691_v40 = vsel %vm625_vm0, %v687_v36, -inf  ;;  %v690_v46 = vsel %vm3575_vm12, %v2664_v38, -1e+30 }
 0x381   :  { %v688_v42 = vsel %vm3562_vm10, %v675_v39, -1e+30  ;;  %692 = vmax.xlane.f32.xlu0 %v691_v40  ;;  %v700_v47 = vsel %vm625_vm0, %v690_v46, -inf }
 0x382   :  { %v694_v44 = vsel %vm625_vm0, %v688_v42, -inf }
 0x383   :  { %695 = vmax.xlane.f32.xlu1 %v694_v44 }
 0x385   :  { %698 = vmax.xlane.f32.xlu0 %v697_v45 }
 0x389   :  { %701 = vmax.xlane.f32.xlu0 %v700_v47 }
 0x40e   :  { %v693_v48 = vpop.xlane.xlu0 %692 }
 0x40f   :  { %v703_v50 = vsub.f32 %v687_v36, %v693_v48 }
 0x410   :  { %v696_v49 = vpop.xlane.xlu1 %695 }
 0x411   :  { %v704_v51 = vsub.f32 %v688_v42, %v696_v49  ;;  %v707_v55 = vmul.f32 1.442695, %v703_v50 }
 0x412   :  { %v699_v52 = vpop.xlane.xlu0 %698 }
 0x413   :  { %v709_v53 = vmul.f32 1.442695, %v704_v51  ;;  %v705_v54 = vsub.f32 %v689_v41, %v699_v52 }
 0x415   :  { %2935 = vpow2.f32 %v709_v53  ;;  %v711_v56 = vmul.f32 1.442695, %v705_v54 }
 0x416   :  { %v702_v57 = vpop.xlane.xlu0 %701 }
 0x417   :  { %2937 = vpow2.f32 %v711_v56  ;;  %v706_v58 = vsub.f32 %v690_v46, %v702_v57 }
 0x418   :  { %2939 = vpow2.f32 %v707_v55 }
 0x419   :  { %v713_v59 = vmul.f32 1.442695, %v706_v58 }
 0x41b   :  { %2941 = vpow2.f32 %v713_v59 }
 0x41f   :  { %v2936_v61 = vpop.eup %2935 }
 0x420   :  { %v718_v62 = vsel %vm625_vm0, %v2936_v61, 0.0 }
 0x421   :  { %v2938_v0 = vpop.eup %2937  ;;  %719 = vadd.xlane.f32.xlu1 %v718_v62 }
 0x422   :  { %v721_v1 = vsel %vm625_vm0, %v2938_v0, 0.0  ;;  %v2940_v2 = vpop.eup %2939 }
 0x423   :  { %722 = vadd.xlane.f32.xlu0 %v721_v1  ;;  %v715_v11 = vsel %vm625_vm0, %v2940_v2, 0.0 }
 0x425   :  { %v2942_v4 = vpop.eup %2941 }
 0x426   :  { %v724_v7 = vsel %vm625_vm0, %v2942_v4, 0.0 }
 0x427   :  { %716 = vadd.xlane.f32.xlu0 %v715_v11  ;;  %725 = vadd.xlane.f32.xlu1 %v724_v7 }
 0x438   :  { %806 = vrot.lane.b32.xlu1 %v3532_v12, %s3288_s1 }
 0x43c   :  { %798 = vrot.lane.b32.xlu1 %v3540_v20, %s3288_s1 }
 0x43d   :  { %804 = vrot.lane.b32.xlu0 %v3524_v37, %s3288_s1 }
 0x440   :  { %800 = vrot.lane.b32.xlu1 %v3544_v8, %s3288_s1 }
 0x4ae   :  { %v720_v9 = vpop.xlane.xlu1 %719 }
 0x4af   :  { %2943 = vrcp.f32 %v720_v9 }
 0x4b0   :  { %v723_v10 = vpop.xlane.xlu0 %722 }
 0x4b1   :  { %2945 = vrcp.f32 %v723_v10 }
 0x4b4   :  { %v717_v13 = vpop.xlane.xlu0 %716  ;;  %v726_v15 = vpop.xlane.xlu1 %725 }
 0x4b5   :  { %2947 = vrcp.f32 %v717_v13 }
 0x4b6   :  { %2949 = vrcp.f32 %v726_v15 }
 0x4b8   :  { %v805_v16 = vpop.permute.xlu0 %804  ;;  %v807_v18 = vpop.permute.xlu1 %806 }
 0x4b9   :  { %2763 = vmatprep.subr.msk.bf16.mxu1 %vm625_vm0, %v805_v16  ;;  %v2944_v60 = vpop.eup %2943  ;;  %v815_v25 = vsel %vm625_vm0, %v805_v16, 0  ;;  %v818_v27 = vsel %vm625_vm0, %v807_v18, 0 }
 0x4ba   :  { %v732_v21 = vmul.f32 %v2944_v60, %v2936_v61 }
 0x4bb   :  { %v2946_v14 = vpop.eup %2945 }
 0x4bc   :  { %v733_v22 = vmul.f32 %v2946_v14, %v2938_v0  ;;  %v799_v26 = vpop.permute.xlu1 %798 }
 0x4bf   :  { %v2948_v63 = vpop.eup %2947 }
 0x4c0   :  { %v2950_v17 = vpop.eup %2949  ;;  %v731_v19 = vmul.f32 %v2948_v63, %v2940_v2  ;;  %v801_v28 = vpop.permute.xlu1 %800 }
 0x4c1   :  { %v734_v6 = vmul.f32 %v2950_v17, %v2942_v4 }
 0x4c2   :  { %v735_v23 = vpack.c.bf16 %v732_v21, %v731_v19 }
 0x4c3   :  { %v736_v24 = vpack.c.bf16 %v734_v6, %v733_v22 }
 0x4c4   :  { %2669 = vmatprep.mubr.msk.bf16.mxu1 %vm625_vm0, %v735_v23 }
 0x4c5   :  { %2670 = vmatmul.mubr.msk.bf16.vlgmr.msra.gmra.mrb[4].mxu1 %vm625_vm0, %v736_v24 }
 0x4c6   :  { %2674 = vmatpush3.bf16.xpose.msra.mxu1 %v815_v25  ;;  %2677 = vmatprep.mubr.msk.bf16.mxu1 %vm625_vm0, %v799_v26 }
 0x4c7   :  { %2764 = vmatprep.subr.msk.bf16.mxu1 %vm625_vm0, %v807_v18 }
 0x4ce   :  { %2676 = vmatpush3.bf16.xpose.msra.mxu1 %v818_v27 }
 0x4d5   :  { %2678 = vmatmul.mubr.msk.bf16.vlgmr.msra.gmra.mrb[8].mxu1 %vm625_vm0, %v801_v28 }
 0x598   :  { %v2671_v29 = vpop.f32.mrb[4].mxu1 }
 0x599   :  { %794 = vst.msk [vmem:[#allocation2 + $0x10] sm:$0xff] %vm625_vm0, %v2671_v29  ;;  %v777_v33 = vpop.f32.mrb[5].mxu1 }
 0x59a   :  { %792 = vst.msk [vmem:[#allocation2] sm:$0xff] %vm625_vm0, %v777_v33  ;;  %v2672_v34 = vpop.f32.mrb[6].mxu1 }
 0x59b   :  { %795 = vst.msk [vmem:[#allocation2 + $0x18] sm:$0xff] %vm625_vm0, %v2672_v34  ;;  %v780_v36 = vpop.f32.mrb[7].mxu1 }
 0x59c   :  { %793 = vst.msk [vmem:[#allocation2 + $0x8] sm:$0xff] %vm625_vm0, %v780_v36 }
 0x5a8   :  { %v2679_v38 = vpop.f32.mrb[8].mxu1 }
 0x5a9   :  { %v854_v39 = vpop.f32.mrb[9].mxu1  ;;  %v871_v45 = vsel %vm3558_vm9, %v2679_v38, -1e+30 }
 0x5aa   :  { %v869_v40 = vsel %vm3552_vm8, %v854_v39, -1e+30  ;;  %v2680_v41 = vpop.f32.mrb[10].mxu1  ;;  %v879_v48 = vsel %vm625_vm0, %v871_v45, -inf }
 0x5ab   :  { %v857_v42 = vpop.f32.mrb[11].mxu1  ;;  %v873_v44 = vsel %vm625_vm0, %v869_v40, -inf  ;;  %v872_v49 = vsel %vm3575_vm12, %v2680_v41, -1e+30 }
 0x5ac   :  { %v870_v46 = vsel %vm3562_vm10, %v857_v42, -1e+30  ;;  %874 = vmax.xlane.f32.xlu0 %v873_v44  ;;  %v882_v50 = vsel %vm625_vm0, %v872_v49, -inf }
 0x5ad   :  { %v876_v47 = vsel %vm625_vm0, %v870_v46, -inf }
 0x5ae   :  { %877 = vmax.xlane.f32.xlu1 %v876_v47 }
 0x5b0   :  { %880 = vmax.xlane.f32.xlu0 %v879_v48 }
 0x5b4   :  { %883 = vmax.xlane.f32.xlu0 %v882_v50 }
 0x5bf   :  { %923 = vrot.lane.b32.xlu1 %v3498_v3, %s3288_s1 }
 0x639   :  { %v875_v51 = vpop.xlane.xlu0 %874 }
 0x63a   :  { %v885_v52 = vsub.f32 %v869_v40, %v875_v51 }
 0x63b   :  { %v878_v53 = vpop.xlane.xlu1 %877 }
 0x63c   :  { %v889_v56 = vmul.f32 1.442695, %v885_v52  ;;  %v886_v57 = vsub.f32 %v870_v46, %v878_v53 }
 0x63d   :  { %v881_v54 = vpop.xlane.xlu0 %880 }
 0x63e   :  { %v887_v55 = vsub.f32 %v871_v45, %v881_v54  ;;  %v891_v62 = vmul.f32 1.442695, %v886_v57 }
 0x63f   :  { %v924_v15 = vpop.permute.xlu1 %923 }
 0x640   :  { %v893_v58 = vmul.f32 1.442695, %v887_v55 }
 0x641   :  { %v884_v59 = vpop.xlane.xlu0 %883 }
 0x642   :  { %2951 = vpow2.f32 %v893_v58  ;;  %v888_v61 = vsub.f32 %v872_v49, %v884_v59 }
 0x643   :  { %2953 = vpow2.f32 %v889_v56 }
 0x644   :  { %v895_v0 = vmul.f32 1.442695, %v888_v61 }
 0x646   :  { %2955 = vpow2.f32 %v895_v0 }
 0x647   :  { %2957 = vpow2.f32 %v891_v62 }
 0x64c   :  { %v2952_v1 = vpop.eup %2951 }
 0x64d   :  { %v903_v2 = vsel %vm625_vm0, %v2952_v1, 0.0  ;;  %v2954_v4 = vpop.eup %2953 }
 0x64e   :  { %904 = vadd.xlane.f32.xlu0 %v903_v2  ;;  %v897_v7 = vsel %vm625_vm0, %v2954_v4, 0.0 }
 0x650   :  { %v2956_v11 = vpop.eup %2955 }
 0x651   :  { %v906_v9 = vsel %vm625_vm0, %v2956_v11, 0.0  ;;  %v2958_v10 = vpop.eup %2957 }
 0x652   :  { %898 = vadd.xlane.f32.xlu0 %v897_v7  ;;  %907 = vadd.xlane.f32.xlu1 %v906_v9  ;;  %v900_v13 = vsel %vm625_vm0, %v2958_v10, 0.0 }
 0x656   :  { %901 = vadd.xlane.f32.xlu1 %v900_v13 }
 0x667   :  { %1007 = vrot.lane.b32.xlu1 %v3524_v37, %s3274_s3 }
 0x668   :  { %921 = vrot.lane.b32.xlu0 %v3501_v5, %s3288_s1 }
 0x66b   :  { %1009 = vrot.lane.b32.xlu1 %v3532_v12, %s3274_s3 }
 0x66c   :  { %1003 = vrot.lane.b32.xlu0 %v3540_v20, %s3274_s3 }
 0x66f   :  { %1005 = vrot.lane.b32.xlu1 %v3544_v8, %s3274_s3 }
 0x6db   :  { %v905_v16 = vpop.xlane.xlu0 %904 }
 0x6df   :  { %v899_v60 = vpop.xlane.xlu0 %898  ;;  %v908_v14 = vpop.xlane.xlu1 %907 }
 0x6e0   :  { %2959 = vrcp.f32 %v908_v14 }
 0x6e1   :  { %2961 = vrcp.f32 %v899_v60 }
 0x6e2   :  { %2963 = vrcp.f32 %v905_v16 }
 0x6e3   :  { %v922_v63 = vpop.permute.xlu0 %921  ;;  %v902_v18 = vpop.xlane.xlu1 %901 }
 0x6e4   :  { %2965 = vrcp.f32 %v902_v18  ;;  %2681 = vmatprep.subr.bf16.mxu0 %v922_v63 }
 0x6e5   :  { %2682 = vmatpush3.bf16.msra.mxu0 %v922_v63 }
 0x6e6   :  { %2683 = vmatprep.subr.bf16.mxu0 %v924_v15 }
 0x6e7   :  { %v1008_v17 = vpop.permute.xlu1 %1007  ;;  %v1004_v29 = vpop.permute.xlu0 %1003 }
 0x6e8   :  { %v1018_v33 = vsel %vm625_vm0, %v1008_v17, 0 }
 0x6e9   :  { %2684 = vmatpush3.bf16.msra.mxu0 %v924_v15 }
 0x6ea   :  { %2765 = vmatprep.subr.msk.bf16.mxu0 %vm625_vm0, %v1008_v17  ;;  %v2960_v19 = vpop.eup %2959 }
 0x6eb   :  { %v2962_v21 = vpop.eup %2961  ;;  %v916_v23 = vmul.f32 %v2960_v19, %v2956_v11  ;;  %v1010_v34 = vpop.permute.xlu1 %1009 }
 0x6ec   :  { %v2964_v22 = vpop.eup %2963  ;;  %v913_v24 = vmul.f32 %v2962_v21, %v2954_v4  ;;  %v1021_v36 = vsel %vm625_vm0, %v1010_v34, 0 }
 0x6ed   :  { %v915_v26 = vmul.f32 %v2964_v22, %v2952_v1 }
 0x6ee   :  { %v2966_v6 = vpop.eup %2965 }
 0x6ef   :  { %v914_v25 = vmul.f32 %v2966_v6, %v2958_v10  ;;  %v918_v28 = vpack.c.bf16 %v916_v23, %v915_v26  ;;  %v1006_v38 = vpop.permute.xlu1 %1005 }
 0x6f1   :  { %v917_v27 = vpack.c.bf16 %v914_v25, %v913_v24 }
 0x6f3   :  { %2685 = vmatprep.mubr.msk.bf16.mxu0 %vm625_vm0, %v917_v27 }
 0x6f4   :  { %2686 = vmatmul.mubr.msk.bf16.vlgmr.msra.gmra.mrb[12].mxu0 %vm625_vm0, %v918_v28 }
 0x6f5   :  { %2690 = vmatpush3.bf16.xpose.msra.mxu0 %v1018_v33  ;;  %2693 = vmatprep.mubr.msk.bf16.mxu0 %vm625_vm0, %v1004_v29 }
 0x6f6   :  { %2766 = vmatprep.subr.msk.bf16.mxu0 %vm625_vm0, %v1010_v34 }
 0x6fd   :  { %2692 = vmatpush3.bf16.xpose.msra.mxu0 %v1021_v36 }
 0x704   :  { %2694 = vmatmul.mubr.msk.bf16.vlgmr.msra.gmra.mrb[16].mxu0 %vm625_vm0, %v1006_v38 }
 0x7c7   :  { %v3644_v39 = vpop.f32.mrb[12].mxu0 }
 0x7c8   :  { %v3646_v40 = vpop.f32.mrb[13].mxu0 }
 0x7c9   :  { %v3648_v41 = vpop.f32.mrb[14].mxu0 }
 0x7ca   :  { %v3650_v42 = vpop.f32.mrb[15].mxu0 }
 0x7d7   :  { %v2695_v44 = vpop.f32.mrb[16].mxu0 }
 0x7d8   :  { %v1057_v45 = vpop.f32.mrb[17].mxu0  ;;  %v1074_v50 = vsel %vm3558_vm9, %v2695_v44, -1e+30 }
 0x7d9   :  { %v1072_v46 = vsel %vm3552_vm8, %v1057_v45, -1e+30  ;;  %v2696_v47 = vpop.f32.mrb[18].mxu0  ;;  %v1082_v53 = vsel %vm625_vm0, %v1074_v50, -inf }
 0x7da   :  { %v1060_v48 = vpop.f32.mrb[19].mxu0  ;;  %v1076_v49 = vsel %vm625_vm0, %v1072_v46, -inf  ;;  %v1075_v54 = vsel %vm3575_vm12, %v2696_v47, -1e+30 }
 0x7db   :  { %v1073_v51 = vsel %vm3562_vm10, %v1060_v48, -1e+30  ;;  %1077 = vmax.xlane.f32.xlu0 %v1076_v49  ;;  %v1085_v55 = vsel %vm625_vm0, %v1075_v54, -inf }
 0x7dc   :  { %v1079_v52 = vsel %vm625_vm0, %v1073_v51, -inf }
 0x7dd   :  { %1080 = vmax.xlane.f32.xlu1 %v1079_v52 }
 0x7df   :  { %1083 = vmax.xlane.f32.xlu0 %v1082_v53 }
 0x7e3   :  { %1086 = vmax.xlane.f32.xlu0 %v1085_v55 }
 0x7ee   :  { %1124 = vrot.lane.b32.xlu1 %v3498_v3, %s3274_s3 }
 0x868   :  { %v1078_v56 = vpop.xlane.xlu0 %1077 }
 0x869   :  { %v1088_v57 = vsub.f32 %v1072_v46, %v1078_v56 }
 0x86a   :  { %v1081_v58 = vpop.xlane.xlu1 %1080 }
 0x86b   :  { %v1092_v62 = vmul.f32 1.442695, %v1088_v57  ;;  %v1089_v0 = vsub.f32 %v1073_v51, %v1081_v58 }
 0x86c   :  { %v1084_v59 = vpop.xlane.xlu0 %1083 }
 0x86d   :  { %v1090_v61 = vsub.f32 %v1074_v50, %v1084_v59  ;;  %v1094_v11 = vmul.f32 1.442695, %v1089_v0 }
 0x86e   :  { %v1125_v18 = vpop.permute.xlu1 %1124 }
 0x86f   :  { %v1096_v1 = vmul.f32 1.442695, %v1090_v61 }
 0x870   :  { %v1087_v2 = vpop.xlane.xlu0 %1086 }
 0x871   :  { %2967 = vpow2.f32 %v1096_v1  ;;  %v1091_v4 = vsub.f32 %v1075_v54, %v1087_v2 }
 0x872   :  { %2969 = vpow2.f32 %v1092_v62 }
 0x873   :  { %v1098_v7 = vmul.f32 1.442695, %v1091_v4 }
 0x875   :  { %2971 = vpow2.f32 %v1098_v7 }
 0x876   :  { %2973 = vpow2.f32 %v1094_v11 }
 0x87b   :  { %v2968_v9 = vpop.eup %2967 }
 0x87c   :  { %v1106_v10 = vsel %vm625_vm0, %v2968_v9, 0.0  ;;  %v2970_v13 = vpop.eup %2969 }
 0x87d   :  { %1107 = vadd.xlane.f32.xlu0 %v1106_v10  ;;  %v1100_v16 = vsel %vm625_vm0, %v2970_v13, 0.0 }
 0x87f   :  { %v2972_v15 = vpop.eup %2971 }
 0x880   :  { %v1109_v60 = vsel %vm625_vm0, %v2972_v15, 0.0  ;;  %v2974_v14 = vpop.eup %2973 }
 0x881   :  { %1101 = vadd.xlane.f32.xlu0 %v1100_v16  ;;  %1110 = vadd.xlane.f32.xlu1 %v1109_v60  ;;  %v1103_v63 = vsel %vm625_vm0, %v2974_v14, 0.0 }
 0x885   :  { %1104 = vadd.xlane.f32.xlu1 %v1103_v63 }
 0x896   :  { %1208 = vrot.lane.b32.xlu1 %v3524_v37, %s3289_s0 }
 0x897   :  { %1122 = vrot.lane.b32.xlu0 %v3501_v5, %s3274_s3 }
 0x89a   :  { %1210 = vrot.lane.b32.xlu1 %v3532_v12, %s3289_s0 }
 0x89b   :  { %1204 = vrot.lane.b32.xlu0 %v3540_v20, %s3289_s0 }
 0x89e   :  { %1206 = vrot.lane.b32.xlu1 %v3544_v8, %s3289_s0 }
 0x90a   :  { %v1108_v17 = vpop.xlane.xlu0 %1107 }
 0x90e   :  { %v1102_v19 = vpop.xlane.xlu0 %1101  ;;  %v1111_v21 = vpop.xlane.xlu1 %1110 }
 0x90f   :  { %2975 = vrcp.f32 %v1111_v21 }
 0x910   :  { %2977 = vrcp.f32 %v1102_v19 }
 0x911   :  { %2979 = vrcp.f32 %v1108_v17 }
 0x912   :  { %v1123_v37 = vpop.permute.xlu0 %1122  ;;  %v1105_v22 = vpop.xlane.xlu1 %1104 }
 0x913   :  { %2981 = vrcp.f32 %v1105_v22  ;;  %2697 = vmatprep.subr.bf16.mxu1 %v1123_v37 }
 0x914   :  { %2698 = vmatpush3.bf16.msra.mxu1 %v1123_v37 }
 0x915   :  { %2699 = vmatprep.subr.bf16.mxu1 %v1125_v18 }
 0x916   :  { %v1209_v12 = vpop.permute.xlu1 %1208  ;;  %v1205_v33 = vpop.permute.xlu0 %1204 }
 0x917   :  { %v1219_v34 = vsel %vm625_vm0, %v1209_v12, 0 }
 0x918   :  { %2700 = vmatpush3.bf16.msra.mxu1 %v1125_v18 }
 0x919   :  { %2767 = vmatprep.subr.msk.bf16.mxu1 %vm625_vm0, %v1209_v12  ;;  %v2976_v20 = vpop.eup %2975 }
 0x91a   :  { %v2978_v6 = vpop.eup %2977  ;;  %v1119_v24 = vmul.f32 %v2976_v20, %v2972_v15  ;;  %v1211_v36 = vpop.permute.xlu1 %1210 }
 0x91b   :  { %v2980_v8 = vpop.eup %2979  ;;  %v1116_v25 = vmul.f32 %v2978_v6, %v2970_v13  ;;  %v1222_v38 = vsel %vm625_vm0, %v1211_v36, 0 }
 0x91c   :  { %v1118_v27 = vmul.f32 %v2980_v8, %v2968_v9 }
 0x91d   :  { %v2982_v23 = vpop.eup %2981 }
 0x91e   :  { %v1117_v26 = vmul.f32 %v2982_v23, %v2974_v14  ;;  %v1121_v29 = vpack.c.bf16 %v1119_v24, %v1118_v27  ;;  %v1207_v44 = vpop.permute.xlu1 %1206 }
 0x920   :  { %v1120_v28 = vpack.c.bf16 %v1117_v26, %v1116_v25 }
 0x922   :  { %2701 = vmatprep.mubr.msk.bf16.mxu1 %vm625_vm0, %v1120_v28 }
 0x923   :  { %2702 = vmatmul.mubr.msk.bf16.vlgmr.msra.gmra.mrb[12].mxu1 %vm625_vm0, %v1121_v29 }
 0x924   :  { %2706 = vmatpush3.bf16.xpose.msra.mxu1 %v1219_v34  ;;  %2709 = vmatprep.mubr.msk.bf16.mxu1 %vm625_vm0, %v1205_v33 }
 0x925   :  { %2768 = vmatprep.subr.msk.bf16.mxu1 %vm625_vm0, %v1211_v36  ;;  %v2823_v36 = vld [vmem:[#allocation12] sm:$0xff]  }
 0x92c   :  { %2708 = vmatpush3.bf16.xpose.msra.mxu1 %v1222_v38  ;;  %v2824_v38 = vld [vmem:[#allocation12 + $0x8] sm:$0xff]  }
 0x933   :  { %2710 = vmatmul.mubr.msk.bf16.vlgmr.msra.gmra.mrb[16].mxu1 %vm625_vm0, %v1207_v44  ;;  %v2825_v44 = vld [vmem:[#allocation12 + $0x10] sm:$0xff]  }
 0x934   :  { %1889 = vmatprep.mubr.bf16.mxu1 %v3285_v30 }
 0x9f6   :  { %v2703_v45 = vpop.f32.mrb[12].mxu1 }
 0x9f7   :  { %v1168_v46 = vpop.f32.mrb[13].mxu1 }
 0x9f8   :  { %v2704_v47 = vpop.f32.mrb[14].mxu1 }
 0x9f9   :  { %v1171_v48 = vpop.f32.mrb[15].mxu1 }
 0xa06   :  { %v2711_v49 = vpop.f32.mrb[16].mxu1 }
 0xa07   :  { %v1258_v50 = vpop.f32.mrb[17].mxu1  ;;  %v1275_v55 = vsel %vm3558_vm9, %v2711_v49, -1e+30  ;;  %v2830_v49 = vld [vmem:[#allocation12 + $0x38] sm:$0xff]  }
 0xa08   :  { %v1273_v51 = vsel %vm3552_vm8, %v1258_v50, -1e+30  ;;  %v2712_v52 = vpop.f32.mrb[18].mxu1  ;;  %v1283_v58 = vsel %vm625_vm0, %v1275_v55, -inf }
 0xa09   :  { %v1261_v53 = vpop.f32.mrb[19].mxu1  ;;  %v1277_v54 = vsel %vm625_vm0, %v1273_v51, -inf  ;;  %v1276_v31 = vsel %vm3575_vm12, %v2712_v52, -1e+30 }
 0xa0a   :  { %v1274_v56 = vsel %vm3562_vm10, %v1261_v53, -1e+30  ;;  %1278 = vmax.xlane.f32.xlu0 %v1277_v54  ;;  %v1286_v59 = vsel %vm625_vm0, %v1276_v31, -inf }
 0xa0b   :  { %v1280_v57 = vsel %vm625_vm0, %v1274_v56, -inf }
 0xa0c   :  { %1281 = vmax.xlane.f32.xlu1 %v1280_v57 }
 0xa0e   :  { %1284 = vmax.xlane.f32.xlu0 %v1283_v58 }
 0xa12   :  { %1287 = vmax.xlane.f32.xlu0 %v1286_v59 }
 0xa97   :  { %v1279_v61 = vpop.xlane.xlu0 %1278 }
 0xa98   :  { %v1289_v62 = vsub.f32 %v1273_v51, %v1279_v61 }
 0xa99   :  { %v1282_v32 = vpop.xlane.xlu1 %1281 }
 0xa9a   :  { %v1293_v35 = vmul.f32 1.442695, %v1289_v62  ;;  %v1290_v2 = vsub.f32 %v1274_v56, %v1282_v32 }
 0xa9b   :  { %v1285_v0 = vpop.xlane.xlu0 %1284 }
 0xa9c   :  { %v1291_v1 = vsub.f32 %v1275_v55, %v1285_v0  ;;  %v1295_v9 = vmul.f32 1.442695, %v1290_v2  ;;  %v2831_v0 = vld [vmem:[#allocation14] ss:$24 sps:$4 sm:$0xff]   ;;  %v2836_v2 = vld [vmem:[#allocation14 + $0xc] ss:$24 sps:$4 sm:$0xff]  }
 0xa9e   :  { %v1297_v4 = vmul.f32 1.442695, %v1291_v1  ;;  %v2833_v1 = vld [vmem:[#allocation14 + $0x4] ss:$24 sps:$4 sm:$0xff]  }
 0xa9f   :  { %v1288_v11 = vpop.xlane.xlu0 %1287  ;;  %1857 = vmatprep.subr.bf16.mxu1 %v2833_v1  ;;  %v2474_v1 = vld [vmem:[%s3849_s7] ss:$0 sm:$0xff]  ;;  %s3290_s7 = smov [#allocation17]  }
 0xaa0   :  { %2983 = vpow2.f32 %v1297_v4  ;;  %v1292_v7 = vsub.f32 %v1276_v31, %v1288_v11  ;;  %v2839_v4 = vld [vmem:[#allocation14 + $0x34] ss:$24 sps:$4 sm:$0xff]   ;;  %1858 = vmatpush1.bf16.msra.mxu1 %v2831_v0  ;;  %s2409_s14 = sshll.u32 %s3290_s7, 4  ;;  %s2410_s14 = int_to_ptr.vmem [resolvable:$true] %s2409_s14 }
 0xaa1   :  { %2985 = vpow2.f32 %v1293_v35  ;;  %v2834_v35 = vld [vmem:[#allocation14 + $0x8] ss:$24 sps:$4 sm:$0xff]   ;;  %v2842_v11 = vld [vmem:[#allocation14 + $0x3c] ss:$24 sps:$4 sm:$0xff]   ;;  %1859 = vmatprep.subr.bf16.mxu1 %v2839_v4  ;;  %s3235_s21 = scalar_lea.vmem %s2410_s14, 512  ;;  %p3240_p9 = scmp.lt.s32.totalorder %s2410_s14, %s2410_s14 }
 0xaa2   :  { %v1299_v10 = vmul.f32 1.442695, %v1292_v7  ;;  %v2837_v7 = vld [vmem:[#allocation14 + $0x30] ss:$24 sps:$4 sm:$0xff]   ;;  %p3236_p8 = scmp.ne.s32.totalorder %s2410_s14, %s3235_s21  ;;  %p3241_p10 = scmp.lt.s32.totalorder %s3235_s21, %s3235_s21 }
 0xaa4   :  { %2987 = vpow2.f32 %v1299_v10  ;;  %v2845_v10 = vld [vmem:[#allocation14 + $0x64] ss:$24 sps:$4 sm:$0xff]   ;;  %1860 = vmatpush1.bf16.msra.mxu1 %v2837_v7  ;;  %v2879_v7 = vld [vmem:[#allocation14 + $0x10] ss:$24 sps:$4 sm:$0xff]   ;;  %p3242_p11 = por %p3241_p10, %p3240_p9 }
 0xaa5   :  { %2989 = vpow2.f32 %v1295_v9  ;;  %v2840_v9 = vld [vmem:[#allocation14 + $0x38] ss:$24 sps:$4 sm:$0xff]   ;;  %1861 = vmatprep.subr.bf16.mxu1 %v2845_v10  ;;  %v2884_v10 = vld [vmem:[#allocation14 + $0x44] ss:$24 sps:$4 sm:$0xff]  }
 0xaa6   :  { %p3243_p12 = pnand %p3242_p11, %p3236_p8 }
 0xaaa   :  { %v2984_v43 = vpop.eup %2983 }
 0xaab   :  { %v1307_v13 = vsel %vm625_vm0, %v2984_v43, 0.0  ;;  %v2986_v15 = vpop.eup %2985 }
 0xaac   :  { %1308 = vadd.xlane.f32.xlu0 %v1307_v13  ;;  %v1301_v60 = vsel %vm625_vm0, %v2986_v15, 0.0  ;;  %v2843_v13 = vld [vmem:[#allocation14 + $0x60] ss:$24 sps:$4 sm:$0xff]  }
 0xaad   :  { %1862 = vmatpush1.bf16.msra.mxu1 %v2843_v13 }
 0xaae   :  { %v2988_v16 = vpop.eup %2987 }
 0xaaf   :  { %v1310_v14 = vsel %vm625_vm0, %v2988_v16, 0.0  ;;  %v2990_v63 = vpop.eup %2989 }
 0xab0   :  { %1302 = vadd.xlane.f32.xlu0 %v1301_v60  ;;  %1311 = vadd.xlane.f32.xlu1 %v1310_v14  ;;  %v1304_v18 = vsel %vm625_vm0, %v2990_v63, 0.0  ;;  %v3055_v14 = vld [vmem:[#allocation3] sm:$0xff] }
 0xab4   :  { %1305 = vadd.xlane.f32.xlu1 %v1304_v18 }
 0xac5   :  { %1325 = vrot.lane.b32.xlu1 %v3498_v3, %s3289_s0 }
 0xac6   :  { %1323 = vrot.lane.b32.xlu0 %v3501_v5, %s3289_s0 }
 0xac9   :  { %986 = vrot.lane.b32.xlu1 %v3646_v40, %s3289_s0 }
 0xaca   :  { %990 = vrot.lane.b32.xlu0 %v3644_v39, %s3289_s0 }
 0xacd   :  { %988 = vrot.lane.b32.xlu1 %v3650_v42, %s3289_s0 }
 0xace   :  { %1187 = vrot.lane.b32.xlu0 %v1168_v46, %s3274_s3  ;;  %v2827_v46 = vld [vmem:[#allocation12 + $0x20] sm:$0xff]  }
 0xad1   :  { %992 = vrot.lane.b32.xlu1 %v3648_v41, %s3289_s0 }
 0xad2   :  { %1191 = vrot.lane.b32.xlu0 %v2703_v45, %s3274_s3  ;;  %v2826_v45 = vld [vmem:[#allocation12 + $0x18] sm:$0xff]  }
 0xad5   :  { %1189 = vrot.lane.b32.xlu1 %v1171_v48, %s3274_s3  ;;  %v2829_v48 = vld [vmem:[#allocation12 + $0x30] sm:$0xff]  }
 0xad9   :  { %1193 = vrot.lane.b32.xlu1 %v2704_v47, %s3274_s3  ;;  %v2828_v47 = vld [vmem:[#allocation12 + $0x28] sm:$0xff]  }
 0xb39   :  { %v1309_v3 = vpop.xlane.xlu0 %1308 }
 0xb3d   :  { %v1303_v5 = vpop.xlane.xlu0 %1302  ;;  %v1312_v40 = vpop.xlane.xlu1 %1311 }
 0xb3e   :  { %2991 = vrcp.f32 %v1312_v40 }
 0xb3f   :  { %2993 = vrcp.f32 %v1303_v5  ;;  %v3056_v5 = vld [vmem:[#allocation3 + $0x10] sm:$0xff] }
 0xb40   :  { %2995 = vrcp.f32 %v1309_v3 }
 0xb41   :  { %v1324_v39 = vpop.permute.xlu0 %1323  ;;  %v1306_v17 = vpop.xlane.xlu1 %1305 }
 0xb42   :  { %2997 = vrcp.f32 %v1306_v17  ;;  %2713 = vmatprep.subr.bf16.mxu0 %v1324_v39 }
 0xb43   :  { %2714 = vmatpush3.bf16.msra.mxu0 %v1324_v39  ;;  %v3057_v39 = vld [vmem:[#allocation3 + $0x8] sm:$0xff] }
 0xb45   :  { %v991_v42 = vpop.permute.xlu0 %990  ;;  %v1326_v41 = vpop.permute.xlu1 %1325 }
 0xb46   :  { %1001 = vst.msk [vmem:[#allocation2 + $0x10] sm:$0xff] %vm998_vm13, %v991_v42  ;;  %2715 = vmatprep.subr.bf16.mxu0 %v1326_v41 }
 0xb47   :  { %2716 = vmatpush3.bf16.msra.mxu0 %v1326_v41 }
 0xb48   :  { %v2992_v19 = vpop.eup %2991  ;;  %2721 = vmatprep.subr.bf16.mxu0 %v2823_v36 }
 0xb49   :  { %v1188_v21 = vpop.permute.xlu0 %1187  ;;  %v987_v37 = vpop.permute.xlu1 %986  ;;  %v1320_v6 = vmul.f32 %v2992_v19, %v2988_v16  ;;  %v3058_v19 = vld [vmem:[#allocation3 + $0x18] sm:$0xff] }
 0xb4a   :  { %v2994_v22 = vpop.eup %2993  ;;  %999 = vst.msk [vmem:[#allocation2] sm:$0xff] %vm998_vm13, %v987_v37 }
 0xb4b   :  { %v2996_v12 = vpop.eup %2995  ;;  %1200 = vst.msk [vmem:[#allocation2] sm:$0xff] %vm1199_vm14, %v1188_v21  ;;  %v1317_v24 = vmul.f32 %v2994_v22, %v2986_v15  ;;  %v2846_v15 = vld [vmem:[#allocation14 + $0x68] ss:$24 sps:$4 sm:$0xff]  }
 0xb4c   :  { %v2998_v20 = vpop.eup %2997  ;;  %v1319_v26 = vmul.f32 %v2996_v12, %v2984_v43  ;;  %v2848_v43 = vld [vmem:[#allocation14 + $0x6c] ss:$24 sps:$4 sm:$0xff]  }
 0xb4d   :  { %v1192_v8 = vpop.permute.xlu0 %1191  ;;  %v989_v23 = vpop.permute.xlu1 %988  ;;  %v1318_v25 = vmul.f32 %v2998_v20, %v2990_v63  ;;  %v2851_v12 = vld [vmem:[#allocation14 + $0x94] ss:$24 sps:$4 sm:$0xff]   ;;  %v2849_v20 = vld [vmem:[#allocation14 + $0x90] ss:$24 sps:$4 sm:$0xff]  }
 0xb4e   :  { %1202 = vst.msk [vmem:[#allocation2 + $0x10] sm:$0xff] %vm1199_vm14, %v1192_v8  ;;  %v1322_v28 = vpack.c.bf16 %v1320_v6, %v1319_v26  ;;  %v2854_v6 = vld [vmem:[#allocation14 + $0x9c] ss:$24 sps:$4 sm:$0xff]   ;;  %1863 = vmatprep.subr.bf16.mxu1 %v2851_v12  ;;  %v2852_v8 = vld [vmem:[#allocation14 + $0x98] ss:$24 sps:$4 sm:$0xff]  }
 0xb4f   :  { %1000 = vst.msk [vmem:[#allocation2 + $0x8] sm:$0xff] %vm998_vm13, %v989_v23  ;;  %v1321_v27 = vpack.c.bf16 %v1318_v25, %v1317_v24  ;;  %1864 = vmatpush1.bf16.msra.mxu1 %v2849_v20  ;;  %v2857_v23 = vld [vmem:[#allocation14 + $0xc4] ss:$24 sps:$4 sm:$0xff]   ;;  %v2855_v24 = vld [vmem:[#allocation14 + $0xc0] ss:$24 sps:$4 sm:$0xff]  }
 0xb50   :  { %v2860_v25 = vld [vmem:[#allocation14 + $0xcc] ss:$24 sps:$4 sm:$0xff]   ;;  %1865 = vmatprep.subr.bf16.mxu1 %v2857_v23  ;;  %v2858_v26 = vld [vmem:[#allocation14 + $0xc8] ss:$24 sps:$4 sm:$0xff]  }
 0xb51   :  { %2717 = vmatprep.mubr.msk.bf16.mxu0 %vm625_vm0, %v1321_v27  ;;  %v993_v29 = vpop.permute.xlu1 %992  ;;  %v2863_v27 = vld [vmem:[#allocation14 + $0xf4] ss:$24 sps:$4 sm:$0xff]   ;;  %v2897_v20 = vld [vmem:[#allocation14 + $0x130] ss:$24 sps:$4 sm:$0xff]   ;;  %v2903_v23 = vld [vmem:[#allocation15 + $0x40] sm:$0xff]  }
 0xb52   :  { %1002 = vst.msk [vmem:[#allocation2 + $0x18] sm:$0xff] %vm998_vm13, %v993_v29  ;;  %2718 = vmatmul.mubr.msk.bf16.vlgmr.msra.gmra.mrb[20].mxu0 %vm625_vm0, %v1322_v28  ;;  %v2861_v28 = vld [vmem:[#allocation14 + $0xf0] ss:$24 sps:$4 sm:$0xff]   ;;  %v2866_v29 = vld [vmem:[#allocation14 + $0xfc] ss:$24 sps:$4 sm:$0xff]  }
 0xb53   :  { %2722 = vmatpush3.bf16.msra.mxu0 %v2823_v36  ;;  %1866 = vmatpush1.bf16.msra.mxu1 %v2855_v24  ;;  %v2869_v36 = vld [vmem:[#allocation14 + $0x124] ss:$24 sps:$4 sm:$0xff]   ;;  %v2899_v12 = vld [vmem:[#allocation14 + $0x134] ss:$24 sps:$4 sm:$0xff]  }
 0xb54   :  { %2723 = vmatprep.subr.bf16.mxu0 %v2824_v38  ;;  %1867 = vmatprep.subr.bf16.mxu1 %v2863_v27  ;;  %v2904_v24 = vld [vmem:[#allocation15] sm:$0xff]   ;;  %v2907_v27 = vld [vmem:[#allocation15 + $0x50] sm:$0xff]  }
 0xb55   :  { %v1190_v33 = vpop.permute.xlu1 %1189 }
 0xb56   :  { %1201 = vst.msk [vmem:[#allocation2 + $0x8] sm:$0xff] %vm1199_vm14, %v1190_v33  ;;  %v2864_v33 = vld [vmem:[#allocation14 + $0xf8] ss:$24 sps:$4 sm:$0xff]  }
 0xb57   :  { %2724 = vmatpush3.bf16.msra.mxu0 %v2824_v38  ;;  %1868 = vmatpush1.bf16.msra.mxu1 %v2861_v28  ;;  %v2870_v38 = vld [vmem:[#allocation14 + $0x128] ss:$24 sps:$4 sm:$0xff]  }
 0xb58   :  { %2725 = vmatprep.subr.bf16.mxu0 %v2825_v44  ;;  %1869 = vmatprep.subr.bf16.mxu1 %v2869_v36  ;;  %v2908_v28 = vld [vmem:[#allocation15 + $0x80] sm:$0xff]   ;;  %v2912_v36 = vld [vmem:[#allocation15 + $0x18] sm:$0xff]  }
 0xb59   :  { %v1194_v34 = vpop.permute.xlu1 %1193 }
 0xb5a   :  { %1203 = vst.msk [vmem:[#allocation2 + $0x18] sm:$0xff] %vm1199_vm14, %v1194_v34  ;;  %v2867_v34 = vld [vmem:[#allocation14 + $0x120] ss:$24 sps:$4 sm:$0xff]  }
 0xb5b   :  { %2726 = vmatpush3.bf16.msra.mxu0 %v2825_v44  ;;  %v2872_v44 = vld [vmem:[#allocation14 + $0x12c] ss:$24 sps:$4 sm:$0xff]   ;;  %1870 = vmatpush1.bf16.msra.mxu1 %v2867_v34 }
 0xb5c   :  { %2727 = vmatprep.subr.bf16.mxu0 %v2826_v45  ;;  %v2911_v34 = vld [vmem:[#allocation15 + $0x88] sm:$0xff]  }
 0xb5f   :  { %2728 = vmatpush3.bf16.msra.mxu0 %v2826_v45  ;;  %v2875_v45 = vld [vmem:[#allocation14 + $0x154] ss:$24 sps:$4 sm:$0xff]  }
 0xb60   :  { %2729 = vmatprep.subr.bf16.mxu0 %v2827_v46  ;;  %1871 = vmatprep.subr.bf16.mxu1 %v2875_v45  ;;  %v2916_v45 = vld [vmem:[#allocation15 + $0x68] sm:$0xff]  }
 0xb63   :  { %2730 = vmatpush3.bf16.msra.mxu0 %v2827_v46  ;;  %v2878_v46 = vld [vmem:[#allocation14 + $0x15c] ss:$24 sps:$4 sm:$0xff]  }
 0xb64   :  { %2731 = vmatprep.subr.bf16.mxu0 %v2828_v47 }
 0xb67   :  { %2732 = vmatpush3.bf16.msra.mxu0 %v2828_v47  ;;  %v2873_v47 = vld [vmem:[#allocation14 + $0x150] ss:$24 sps:$4 sm:$0xff]  }
 0xb68   :  { %2733 = vmatprep.subr.bf16.mxu0 %v2829_v48  ;;  %1872 = vmatpush1.bf16.msra.mxu1 %v2873_v47  ;;  %v2918_v47 = vld [vmem:[#allocation15 + $0x28] sm:$0xff]  }
 0xb6b   :  { %2734 = vmatpush3.bf16.msra.mxu0 %v2829_v48  ;;  %v2876_v48 = vld [vmem:[#allocation14 + $0x158] ss:$24 sps:$4 sm:$0xff]  }
 0xb6c   :  { %2735 = vmatprep.subr.bf16.mxu0 %v2830_v49 }
 0xb6f   :  { %2736 = vmatpush3.bf16.msra.mxu0 %v2830_v49  ;;  %v2881_v49 = vld [vmem:[#allocation14 + $0x14] ss:$24 sps:$4 sm:$0xff]  }
 0xb70   :  { %1910 = vmatprep.subr.bf16.mxu0 %v2836_v2  ;;  %1963 = vmatprep.subr.bf16.mxu1 %v2881_v49  ;;  %v2920_v49 = vld [vmem:[#allocation15 + $0xa0] sm:$0xff]  }
 0xc25   :  { %v2719_v50 = vpop.f32.mrb[20].mxu0 }
 0xc26   :  { %v1369_v51 = vpop.f32.mrb[21].mxu0 }
 0xc27   :  { %1388 = vrot.lane.b32.xlu0 %v1369_v51, %s3288_s1  ;;  %v2720_v52 = vpop.f32.mrb[22].mxu0 }
 0xc28   :  { %v1372_v53 = vpop.f32.mrb[23].mxu0 }
 0xc29   :  { %1390 = vrot.lane.b32.xlu1 %v1372_v53, %s3288_s1 }
 0xc2b   :  { %1392 = vrot.lane.b32.xlu0 %v2719_v50, %s3288_s1 }
 0xc2d   :  { %1394 = vrot.lane.b32.xlu1 %v2720_v52, %s3288_s1 }
 0xc99   :  { %v1389_v54 = vpop.permute.xlu0 %1388 }
 0xc9a   :  { %1401 = vst.msk [vmem:[#allocation2] sm:$0xff] %vm1400_vm15, %v1389_v54 }
 0xc9b   :  { %v1391_v55 = vpop.permute.xlu1 %1390 }
 0xc9c   :  { %1402 = vst.msk [vmem:[#allocation2 + $0x8] sm:$0xff] %vm1400_vm15, %v1391_v55 }
 0xc9d   :  { %v1393_v56 = vpop.permute.xlu0 %1392 }
 0xc9e   :  { %1403 = vst.msk [vmem:[#allocation2 + $0x10] sm:$0xff] %vm1400_vm15, %v1393_v56 }
 0xc9f   :  { %v1395_v57 = vpop.permute.xlu1 %1394 }
 0xca0   :  { %1404 = vst.msk [vmem:[#allocation2 + $0x18] sm:$0xff] %vm1400_vm15, %v1395_v57 }
 0xca1   :  { %v1405_v58 = vld [vmem:[#allocation2] sm:$0xff] }
 0xca3   :  { %v1406_v31 = vld [vmem:[#allocation2 + $0x8] sm:$0xff] }
 0xca4   :  { %v1409_v59 = vpack.c.bf16 %v1406_v31, %v1405_v58 }
 0xca5   :  { %v1407_v61 = vld [vmem:[#allocation2 + $0x10] sm:$0xff] }
 0xca6   :  { %2737 = vmatprep.mubr.bf16.mxu0 %v1409_v59 }
 0xca7   :  { %v1408_v62 = vld [vmem:[#allocation2 + $0x18] sm:$0xff] }
 0xca8   :  { %v1410_v32 = vpack.c.bf16 %v1408_v62, %v1407_v61 }
 0xcaa   :  { %2738 = vmatmul.mubr.bf16.vlgmr.msra.gmra.mrb[24].mxu0 %v1410_v32 }
 0xcab   :  { %1942 = vmatprep.mubr.bf16.mxu0 %v3285_v30  ;;  %1911 = vmatpush1.bf16.msra.mxu0 %v2834_v35 }
 0xcac   :  { %1912 = vmatprep.subr.bf16.mxu0 %v2842_v11 }
 0xcaf   :  { %1913 = vmatpush1.bf16.msra.mxu0 %v2840_v9 }
 0xcb0   :  { %1914 = vmatprep.subr.bf16.mxu0 %v2848_v43 }
 0xcb3   :  { %1915 = vmatpush1.bf16.msra.mxu0 %v2846_v15 }
 0xcb4   :  { %1916 = vmatprep.subr.bf16.mxu0 %v2854_v6  ;;  %v2902_v6 = vld [vmem:[#allocation14 + $0x164] ss:$24 sps:$4 sm:$0xff]  }
 0xcb7   :  { %1917 = vmatpush1.bf16.msra.mxu0 %v2852_v8  ;;  %v2900_v8 = vld [vmem:[#allocation14 + $0x160] ss:$24 sps:$4 sm:$0xff]  }
 0xcb8   :  { %1918 = vmatprep.subr.bf16.mxu0 %v2860_v25  ;;  %v2905_v25 = vld [vmem:[#allocation15 + $0x48] sm:$0xff]  }
 0xcbb   :  { %1919 = vmatpush1.bf16.msra.mxu0 %v2858_v26  ;;  %v2906_v26 = vld [vmem:[#allocation15 + $0x8] sm:$0xff]  }
 0xcbc   :  { %1920 = vmatprep.subr.bf16.mxu0 %v2866_v29  ;;  %v2909_v29 = vld [vmem:[#allocation15 + $0x10] sm:$0xff]  }
 0xcbf   :  { %1921 = vmatpush1.bf16.msra.mxu0 %v2864_v33  ;;  %v2910_v33 = vld [vmem:[#allocation15 + $0x58] sm:$0xff]  }
 0xcc0   :  { %1922 = vmatprep.subr.bf16.mxu0 %v2872_v44  ;;  %v2915_v44 = vld [vmem:[#allocation15 + $0x20] sm:$0xff]  }
 0xcc3   :  { %1923 = vmatpush1.bf16.msra.mxu0 %v2870_v38  ;;  %v2914_v38 = vld [vmem:[#allocation15 + $0x90] sm:$0xff]  }
 0xcc4   :  { %1924 = vmatprep.subr.bf16.mxu0 %v2878_v46  ;;  %v2917_v46 = vld [vmem:[#allocation15 + $0x98] sm:$0xff]  }
 0xcc7   :  { %1925 = vmatpush1.bf16.msra.mxu0 %v2876_v48  ;;  %v2919_v48 = vld [vmem:[#allocation15 + $0x70] sm:$0xff]  }
 0xcc8   :  { %2599 = vmatprep.subr.bf16.mxu0 %v2903_v23 }
 0xd7d   :  { %v2739_v16 = vpop.f32.mrb[24].mxu0 }
 0xd7e   :  { %v1509_v60 = vpop.f32.mrb[25].mxu0  ;;  %v3738_v40 = vadd.f32 %v3056_v5, %v2739_v16  ;;  %v2882_v16 = vld [vmem:[#allocation14 + $0x40] ss:$24 sps:$4 sm:$0xff]  }
 0xd7f   :  { %v3736_v63 = vadd.f32 %v3055_v14, %v1509_v60  ;;  %v2740_v18 = vpop.f32.mrb[26].mxu0  ;;  %v2887_v60 = vld [vmem:[#allocation14 + $0x74] ss:$24 sps:$4 sm:$0xff]  }
 0xd80   :  { %v1512_v3 = vpop.f32.mrb[27].mxu0  ;;  %v3746_v21 = vadd.f32 %v3058_v19, %v2740_v18  ;;  %v1530_v37 = vmul.f32 %v3738_v40, %v3738_v40  ;;  %v2891_v19 = vld [vmem:[#allocation14 + $0xd0] ss:$24 sps:$4 sm:$0xff]  }
 0xd81   :  { %v3740_v17 = vadd.f32 %v3057_v39, %v1512_v3  ;;  %v1528_v42 = vmul.f32 %v3736_v63, %v3736_v63  ;;  %v2885_v3 = vld [vmem:[#allocation14 + $0x70] ss:$24 sps:$4 sm:$0xff]   ;;  %v2890_v39 = vld [vmem:[#allocation14 + $0xa4] ss:$24 sps:$4 sm:$0xff]  }
 0xd82   :  { %v1531_v22 = vmul.f32 %v3746_v21, %v3746_v21 }
 0xd83   :  { %1532 = vadd.xlane.f32.xlu0 %v1528_v42  ;;  %v1529_v41 = vmul.f32 %v3740_v17, %v3740_v17  ;;  %v2888_v42 = vld [vmem:[#allocation14 + $0xa0] ss:$24 sps:$4 sm:$0xff]  }
 0xd85   :  { %1534 = vadd.xlane.f32.xlu1 %v1529_v41  ;;  %v2893_v41 = vld [vmem:[#allocation14 + $0xd4] ss:$24 sps:$4 sm:$0xff]  }
 0xd87   :  { %1536 = vadd.xlane.f32.xlu0 %v1530_v37  ;;  %v2896_v37 = vld [vmem:[#allocation14 + $0x104] ss:$24 sps:$4 sm:$0xff]  }
 0xd8b   :  { %1538 = vadd.xlane.f32.xlu0 %v1531_v22  ;;  %v2894_v22 = vld [vmem:[#allocation14 + $0x100] ss:$24 sps:$4 sm:$0xff]  }
 0xe10   :  { %v1533_v50 = vpop.xlane.xlu0 %1532 }
 0xe11   :  { %v1540_v51 = vmul.f32 0.0078125, %v1533_v50  ;;  %v2921_v50 = vld [vmem:[#allocation15 + $0x30] sm:$0xff]  }
 0xe12   :  { %v1535_v52 = vpop.xlane.xlu1 %1534 }
 0xe13   :  { %v1544_v53 = vadd.f32 1e-05, %v1540_v51  ;;  %v1541_v54 = vmul.f32 0.0078125, %v1535_v52  ;;  %v2922_v51 = vld [vmem:[#allocation15 + $0x78] sm:$0xff]   ;;  %v2923_v52 = vld [vmem:[#allocation15 + $0xa8] sm:$0xff]  }
 0xe14   :  { %v1537_v55 = vpop.xlane.xlu0 %1536 }
 0xe15   :  { %2999 = vrsqrt.f32 %v1544_v53  ;;  %v1545_v56 = vadd.f32 1e-05, %v1541_v54  ;;  %v1542_v57 = vmul.f32 0.0078125, %v1537_v55  ;;  %v2924_v53 = vld [vmem:[#allocation15 + $0x38] sm:$0xff]   ;;  %v2925_v54 = vld [vmem:[#allocation15 + $0xb0] sm:$0xff]  }
 0xe16   :  { %v2926_v55 = vld [vmem:[#allocation15 + $0xb8] sm:$0xff]  }
 0xe17   :  { %3001 = vrsqrt.f32 %v1545_v56  ;;  %v1546_v58 = vadd.f32 1e-05, %v1542_v57 }
 0xe18   :  { %v1539_v31 = vpop.xlane.xlu0 %1538 }
 0xe19   :  { %v1543_v59 = vmul.f32 0.0078125, %v1539_v31  ;;  %3003 = vrsqrt.f32 %v1546_v58 }
 0xe1b   :  { %v1547_v61 = vadd.f32 1e-05, %v1543_v59 }
 0xe1d   :  { %3005 = vrsqrt.f32 %v1547_v61 }
 0xe1f   :  { %v3000_v62 = vpop.eup %2999 }
 0xe20   :  { %v1552_v32 = vmul.f32 %v3000_v62, %v3736_v63 }
 0xe21   :  { %v3002_v0 = vpop.eup %3001 }
 0xe22   :  { %v1553_v35 = vmul.f32 %v3002_v0, %v3740_v17  ;;  %v1563_v2 = vmul.f32 %v2474_v1, %v1552_v32 }
 0xe23   :  { %v3004_v11 = vpop.eup %3003 }
 0xe24   :  { %v1564_v4 = vmul.f32 %v2474_v1, %v1553_v35  ;;  %v1554_v13 = vmul.f32 %v3004_v11, %v3738_v40 }
 0xe26   :  { %v1567_v9 = vpack.c.bf16 %v1564_v4, %v1563_v2  ;;  %v1565_v18 = vmul.f32 %v2474_v1, %v1554_v13 }
 0xe27   :  { %v3006_v43 = vpop.eup %3005 }
 0xe28   :  { %1890 = vmatmul.mubr.bf16.vlgmr.msra.gmra.mrb[20].mxu1 %v1567_v9  ;;  %1943 = vmatmul.mubr.bf16.vlgmr.msra.gmra.mrb[28].mxu0 %v1567_v9  ;;  %v1555_v15 = vmul.f32 %v3006_v43, %v3746_v21 }
 0xe29   :  { %1964 = vmatpush1.bf16.msra.mxu1 %v2879_v7  ;;  %1899 = vmatprep.mubr.bf16.mxu1 %v3285_v30 }
 0xe2a   :  { %1965 = vmatprep.subr.bf16.mxu1 %v2884_v10  ;;  %1952 = vmatprep.mubr.bf16.mxu0 %v3285_v30  ;;  %v1566_v14 = vmul.f32 %v2474_v1, %v1555_v15 }
 0xe2b   :  { %2600 = vmatpush3.bf16.msra.mxu0 %v2904_v24 }
 0xe2c   :  { %v1568_v5 = vpack.c.bf16 %v1566_v14, %v1565_v18  ;;  %2601 = vmatprep.subr.bf16.mxu0 %v2905_v25 }
 0xe2d   :  { %1966 = vmatpush1.bf16.msra.mxu1 %v2882_v16 }
 0xe2e   :  { %1967 = vmatprep.subr.bf16.mxu1 %v2887_v60 }
 0xe2f   :  { %2602 = vmatpush3.bf16.msra.mxu0 %v2906_v26 }
 0xe30   :  { %1900 = vmatmul.mubr.bf16.gmra.mrb[24].mxu1 %v1568_v5  ;;  %1953 = vmatmul.mubr.bf16.gmra.mrb[32].mxu0 %v1568_v5 }
 0xe31   :  { %1968 = vmatpush1.bf16.msra.mxu1 %v2885_v3  ;;  %1995 = vmatprep.mubr.bf16.mxu1 %v3285_v30 }
 0xe32   :  { %1969 = vmatprep.subr.bf16.mxu1 %v2890_v39  ;;  %2603 = vmatprep.subr.bf16.mxu0 %v2907_v27 }
 0xe33   :  { %2604 = vmatpush3.bf16.msra.mxu0 %v2909_v29 }
 0xe34   :  { %2605 = vmatprep.subr.bf16.mxu0 %v2910_v33 }
 0xe35   :  { %1970 = vmatpush1.bf16.msra.mxu1 %v2888_v42 }
 0xe36   :  { %1971 = vmatprep.subr.bf16.mxu1 %v2893_v41 }
 0xe37   :  { %2606 = vmatpush3.bf16.msra.mxu0 %v2912_v36 }
 0xe39   :  { %1972 = vmatpush1.bf16.msra.mxu1 %v2891_v19 }
 0xe3a   :  { %1973 = vmatprep.subr.bf16.mxu1 %v2896_v37 }
 0xe3d   :  { %1974 = vmatpush1.bf16.msra.mxu1 %v2894_v22 }
 0xe3e   :  { %1975 = vmatprep.subr.bf16.mxu1 %v2899_v12 }
 0xe41   :  { %1976 = vmatpush1.bf16.msra.mxu1 %v2897_v20 }
 0xe42   :  { %1977 = vmatprep.subr.bf16.mxu1 %v2902_v6 }
 0xe45   :  { %1978 = vmatpush1.bf16.msra.mxu1 %v2900_v8 }
 0xe46   :  { %2741 = vmatprep.subr.bf16.mxu1 %v2908_v28 }
 0xe48   :  { %1996 = vmatmul.mubr.bf16.vlgmr.msra.gmra.mrb[28].mxu1 %v1567_v9 }
 0xe49   :  { %2005 = vmatprep.mubr.bf16.mxu1 %v3285_v30  ;;  %2742 = vmatpush3.bf16.msra.mxu1 %v2908_v28  ;;  %v2913_v30 = vld [vmem:[#allocation15 + $0x60] sm:$0xff]  }
 0xe4a   :  { %2743 = vmatprep.subr.bf16.mxu1 %v2911_v34  ;;  %2607 = vmatprep.subr.bf16.mxu0 %v2913_v30 }
 0xe4b   :  { %2608 = vmatpush3.bf16.msra.mxu0 %v2915_v44 }
 0xe4c   :  { %2609 = vmatprep.subr.bf16.mxu0 %v2916_v45 }
 0xe4d   :  { %2744 = vmatpush3.bf16.msra.mxu1 %v2911_v34 }
 0xe4e   :  { %2745 = vmatprep.subr.bf16.mxu1 %v2914_v38 }
 0xe4f   :  { %2610 = vmatpush3.bf16.msra.mxu0 %v2918_v47 }
 0xe50   :  { %2006 = vmatmul.mubr.bf16.gmra.mrb[32].mxu1 %v1568_v5  ;;  %2611 = vmatprep.subr.bf16.mxu0 %v2919_v48 }
 0xe51   :  { %2746 = vmatpush3.bf16.msra.mxu1 %v2914_v38 }
 0xe52   :  { %2747 = vmatprep.subr.bf16.mxu1 %v2917_v46 }
 0xe53   :  { %2612 = vmatpush3.bf16.msra.mxu0 %v2921_v50 }
 0xe54   :  { %2613 = vmatprep.subr.bf16.mxu0 %v2922_v51 }
 0xe55   :  { %2748 = vmatpush3.bf16.msra.mxu1 %v2917_v46 }
 0xe56   :  { %2749 = vmatprep.subr.bf16.mxu1 %v2920_v49 }
 0xe57   :  { %2614 = vmatpush3.bf16.msra.mxu0 %v2924_v53 }
 0xe59   :  { %2750 = vmatpush3.bf16.msra.mxu1 %v2920_v49 }
 0xe5a   :  { %2751 = vmatprep.subr.bf16.mxu1 %v2923_v52 }
 0xe5d   :  { %2752 = vmatpush3.bf16.msra.mxu1 %v2923_v52 }
 0xe5e   :  { %2753 = vmatprep.subr.bf16.mxu1 %v2925_v54 }
 0xe61   :  { %2754 = vmatpush3.bf16.msra.mxu1 %v2925_v54 }
 0xe62   :  { %2755 = vmatprep.subr.bf16.mxu1 %v2926_v55 }
 0xe65   :  { %2756 = vmatpush3.bf16.msra.mxu1 %v2926_v55 }
 0xefb   :  { %v3763_v56 = vpop.f32.mrb[20].mxu1  ;;  %v3765_v57 = vpop.f32.mrb[28].mxu0 }
 0xefc   :  { %v2016_v58 = vsub.f32 0.0, %v3763_v56  ;;  %v2018_v31 = vsub.f32 0.0, %v3765_v57  ;;  %v3769_v59 = vpop.f32.mrb[21].mxu1  ;;  %v3771_v61 = vpop.f32.mrb[29].mxu0 }
 0xefd   :  { %v2017_v62 = vsub.f32 0.0, %v3769_v59  ;;  %v3774_v32 = vpop.f32.mrb[22].mxu1  ;;  %v3776_v0 = vpop.f32.mrb[30].mxu0 }
 0xefe   :  { %v2028_v1 = vmul.f32 1.442695, %v2016_v58  ;;  %v2032_v35 = vmul.f32 1.442695, %v2018_v31  ;;  %v2019_v2 = vsub.f32 0.0, %v3774_v32  ;;  %v2021_v4 = vsub.f32 0.0, %v3776_v0 }
 0xeff   :  { %v2030_v11 = vmul.f32 1.442695, %v2017_v62  ;;  %v3780_v7 = vpop.f32.mrb[23].mxu1  ;;  %v3782_v9 = vpop.f32.mrb[31].mxu0 }
 0xf00   :  { %3007 = vpow2.f32 %v2028_v1  ;;  %v2034_v10 = vmul.f32 1.442695, %v2019_v2  ;;  %v2038_v43 = vmul.f32 1.442695, %v2021_v4  ;;  %v2020_v13 = vsub.f32 0.0, %v3780_v7 }
 0xf01   :  { %3009 = vpow2.f32 %v2032_v35 }
 0xf02   :  { %3011 = vpow2.f32 %v2030_v11  ;;  %v2036_v15 = vmul.f32 1.442695, %v2020_v13 }
 0xf03   :  { %3013 = vpow2.f32 %v2034_v10  ;;  %v3785_v16 = vpop.f32.mrb[24].mxu1  ;;  %v3787_v60 = vpop.f32.mrb[32].mxu0 }
 0xf04   :  { %3015 = vpow2.f32 %v2038_v43  ;;  %v2022_v14 = vsub.f32 0.0, %v3785_v16  ;;  %v2024_v18 = vsub.f32 0.0, %v3787_v60  ;;  %v3791_v3 = vpop.f32.mrb[25].mxu1  ;;  %v3793_v5 = vpop.f32.mrb[33].mxu0 }
 0xf05   :  { %3017 = vpow2.f32 %v2036_v15  ;;  %v2023_v39 = vsub.f32 0.0, %v3791_v3  ;;  %v3796_v42 = vpop.f32.mrb[26].mxu1  ;;  %v3798_v41 = vpop.f32.mrb[34].mxu0 }
 0xf06   :  { %v2040_v19 = vmul.f32 1.442695, %v2022_v14  ;;  %v2044_v37 = vmul.f32 1.442695, %v2024_v18  ;;  %v2025_v22 = vsub.f32 0.0, %v3796_v42  ;;  %v2027_v12 = vsub.f32 0.0, %v3798_v41 }
 0xf07   :  { %v2042_v20 = vmul.f32 1.442695, %v2023_v39  ;;  %v3802_v6 = vpop.f32.mrb[27].mxu1  ;;  %v3804_v8 = vpop.f32.mrb[35].mxu0 }
 0xf08   :  { %3019 = vpow2.f32 %v2040_v19  ;;  %v2046_v23 = vmul.f32 1.442695, %v2025_v22  ;;  %v2050_v24 = vmul.f32 1.442695, %v2027_v12  ;;  %v2026_v28 = vsub.f32 0.0, %v3802_v6 }
 0xf09   :  { %3021 = vpow2.f32 %v2044_v37 }
 0xf0a   :  { %v3008_v25 = vpop.eup %3007  ;;  %3023 = vpow2.f32 %v2042_v20  ;;  %v2048_v46 = vmul.f32 1.442695, %v2026_v28 }
 0xf0b   :  { %v3010_v26 = vpop.eup %3009  ;;  %v2052_v27 = vadd.f32 1.0, %v3008_v25  ;;  %3025 = vpow2.f32 %v2046_v23 }
 0xf0c   :  { %v3012_v29 = vpop.eup %3011  ;;  %v2054_v33 = vadd.f32 1.0, %v3010_v26  ;;  %3027 = vpow2.f32 %v2050_v24 }
 0xf0d   :  { %v3014_v34 = vpop.eup %3013  ;;  %3029 = vrcp.f32 %v2052_v27  ;;  %v2053_v36 = vadd.f32 1.0, %v3012_v29 }
 0xf0e   :  { %v3016_v30 = vpop.eup %3015  ;;  %3031 = vrcp.f32 %v2054_v33  ;;  %v2055_v38 = vadd.f32 1.0, %v3014_v34 }
 0xf0f   :  { %v3018_v44 = vpop.eup %3017  ;;  %3033 = vrcp.f32 %v2053_v36  ;;  %v2057_v45 = vadd.f32 1.0, %v3016_v30 }
 0xf10   :  { %3035 = vrcp.f32 %v2055_v38  ;;  %v2056_v47 = vadd.f32 1.0, %v3018_v44 }
 0xf11   :  { %3037 = vrcp.f32 %v2057_v45 }
 0xf12   :  { %v3020_v48 = vpop.eup %3019  ;;  %3039 = vrcp.f32 %v2056_v47 }
 0xf13   :  { %v3022_v49 = vpop.eup %3021  ;;  %v2058_v50 = vadd.f32 1.0, %v3020_v48  ;;  %3041 = vpow2.f32 %v2048_v46 }
 0xf14   :  { %v3024_v51 = vpop.eup %3023  ;;  %v2060_v52 = vadd.f32 1.0, %v3022_v49 }
 0xf15   :  { %v3026_v53 = vpop.eup %3025  ;;  %3043 = vrcp.f32 %v2058_v50  ;;  %v2059_v54 = vadd.f32 1.0, %v3024_v51 }
 0xf16   :  { %v3028_v55 = vpop.eup %3027  ;;  %3045 = vrcp.f32 %v2060_v52  ;;  %v2061_v58 = vadd.f32 1.0, %v3026_v53 }
 0xf17   :  { %v3030_v31 = vpop.eup %3029  ;;  %3047 = vrcp.f32 %v2059_v54  ;;  %v2063_v62 = vadd.f32 1.0, %v3028_v55 }
 0xf18   :  { %v3032_v1 = vpop.eup %3031  ;;  %v2076_v35 = vmul.f32 %v3030_v31, %v3763_v56  ;;  %3049 = vrcp.f32 %v2061_v58 }
 0xf19   :  { %v3034_v2 = vpop.eup %3033  ;;  %3051 = vrcp.f32 %v2063_v62  ;;  %v2078_v13 = vmul.f32 %v3032_v1, %v3765_v57 }
 0xf1a   :  { %v3036_v4 = vpop.eup %3035  ;;  %v2077_v11 = vmul.f32 %v3034_v2, %v3769_v59  ;;  %v2088_v10 = vmul.f32 %v2076_v35, %v3771_v61 }
 0xf1b   :  { %v3038_v43 = vpop.eup %3037  ;;  %v2079_v15 = vmul.f32 %v3036_v4, %v3774_v32  ;;  %v1997_v14 = vpop.f32.mrb[28].mxu1 }
 0xf1c   :  { %v3040_v18 = vpop.eup %3039  ;;  %v2089_v39 = vmul.f32 %v2077_v11, %v1997_v14  ;;  %v1999_v19 = vpop.f32.mrb[29].mxu1  ;;  %v2081_v56 = vmul.f32 %v3038_v43, %v3776_v0 }
 0xf1d   :  { %v3042_v37 = vpop.eup %3041  ;;  %v2080_v22 = vmul.f32 %v3040_v18, %v3780_v7  ;;  %v2091_v12 = vmul.f32 %v2079_v15, %v3782_v9  ;;  %v2090_v20 = vmul.f32 %v2078_v13, %v1999_v19  ;;  %v2001_v59 = vpop.f32.mrb[30].mxu1 }
 0xf1e   :  { %v2062_v23 = vadd.f32 1.0, %v3042_v37  ;;  %v2003_v61 = vpop.f32.mrb[31].mxu1 }
 0xf1f   :  { %v3044_v24 = vpop.eup %3043  ;;  %v2100_v25 = vpack.c.bf16 %v2091_v12, %v2088_v10  ;;  %v2092_v57 = vmul.f32 %v2080_v22, %v2001_v59  ;;  %v2093_v26 = vmul.f32 %v2081_v56, %v2003_v61 }
 0xf20   :  { %v3046_v32 = vpop.eup %3045  ;;  %v2082_v27 = vmul.f32 %v3044_v24, %v3785_v16  ;;  %3053 = vrcp.f32 %v2062_v23 }
 0xf21   :  { %v3048_v28 = vpop.eup %3047  ;;  %v2101_v29 = vpack.c.bf16 %v2092_v57, %v2089_v39  ;;  %v2102_v33 = vpack.c.bf16 %v2093_v26, %v2090_v20  ;;  %v2084_v36 = vmul.f32 %v3046_v32, %v3787_v60 }
 0xf22   :  { %v3050_v0 = vpop.eup %3049  ;;  %v2083_v7 = vmul.f32 %v3048_v28, %v3791_v3  ;;  %v2094_v9 = vmul.f32 %v2082_v27, %v3793_v5 }
 0xf23   :  { %v3052_v34 = vpop.eup %3051  ;;  %v2085_v30 = vmul.f32 %v3050_v0, %v3796_v42  ;;  %2330 = vmatprep.mubr.bf16.mxu0 %v2101_v29  ;;  %v2007_v38 = vpop.f32.mrb[32].mxu1  ;;  %2757 = vmatprep.mubr.bf16.mxu1 %v2102_v33 }
 0xf24   :  { %v2095_v44 = vmul.f32 %v2083_v7, %v2007_v38  ;;  %2331 = vmatmul.mubr.bf16.vlgmr.msra.gmra.mrb[36].mxu0 %v2100_v25  ;;  %v2009_v16 = vpop.f32.mrb[33].mxu1  ;;  %v2087_v45 = vmul.f32 %v3052_v34, %v3798_v41 }
 0xf25   :  { %v2097_v46 = vmul.f32 %v2085_v30, %v3804_v8  ;;  %v2096_v47 = vmul.f32 %v2084_v36, %v2009_v16  ;;  %v2011_v48 = vpop.f32.mrb[34].mxu1 }
 0xf26   :  { %v2013_v3 = vpop.f32.mrb[35].mxu1 }
 0xf27   :  { %v2103_v49 = vpack.c.bf16 %v2097_v46, %v2094_v9  ;;  %v2099_v5 = vmul.f32 %v2087_v45, %v2013_v3 }
 0xf29   :  { %v2105_v50 = vpack.c.bf16 %v2099_v5, %v2096_v47 }
 0xf2a   :  { %v3054_v51 = vpop.eup %3053 }
 0xf2b   :  { %v2086_v60 = vmul.f32 %v3054_v51, %v3802_v6  ;;  %2758 = vmatmul.mubr.bf16.vlgmr.msra.gmra.mrb[36].mxu1 %v2105_v50 }
 0xf2d   :  { %v2098_v42 = vmul.f32 %v2086_v60, %v2011_v48 }
 0xf2f   :  { %v2104_v52 = vpack.c.bf16 %v2098_v42, %v2095_v44 }
 0xf31   :  { %2338 = vmatprep.mubr.bf16.mxu0 %v2104_v52 }
 0xf32   :  { %2339 = vmatmul.mubr.bf16.gmra.mrb[40].mxu0 %v2103_v49 }
 0xff7   :  { %v2615_v53 = vpop.f32.mrb[36].mxu0 }
 0xff8   :  { %v2616_v54 = vpop.f32.mrb[37].mxu0 }
 0xff9   :  { %v2617_v55 = vadd.f32 %v2616_v54, %v2615_v53  ;;  %v2618_v41 = vpop.f32.mrb[38].mxu0 }
 0xffa   :  { %v2619_v58 = vpop.f32.mrb[39].mxu0 }
 0xffb   :  { %v2620_v8 = vadd.f32 %v2619_v58, %v2618_v41 }
 0xffe   :  { %v2759_v31 = vpop.f32.mrb[36].mxu1 }
 0xfff   :  { %v2381_v62 = vpop.f32.mrb[37].mxu1 }
0x1000   :  { %v2382_v1 = vadd.f32 %v2617_v55, %v2381_v62  ;;  %v2760_v35 = vpop.f32.mrb[38].mxu1 }
0x1001   :  { %v2384_v2 = vpop.f32.mrb[39].mxu1 }
0x1002   :  { %v2396_v4 = vadd.f32 %v2382_v1, %v3736_v63  ;;  %v2385_v11 = vadd.f32 %v2620_v8, %v2384_v2 }
0x1004   :  { %2400 = vst [vmem:[#allocation17] sm:$0xff] %v2396_v4  ;;  %v2397_v6 = vadd.f32 %v2385_v11, %v3740_v17 }
0x1005   :  { %v2621_v10 = vpop.f32.mrb[40].mxu0 }
0x1006   :  { %v2622_v43 = vpop.f32.mrb[41].mxu0  ;;  %2401 = vst [vmem:[#allocation17 + $0x8] sm:$0xff] %v2397_v6 }
0x1007   :  { %v2623_v13 = vadd.f32 %v2622_v43, %v2621_v10  ;;  %v2624_v15 = vpop.f32.mrb[42].mxu0 }
0x1008   :  { %v2625_v14 = vpop.f32.mrb[43].mxu0 }
0x1009   :  { %v2390_v18 = vadd.f32 %v2759_v31, %v2623_v13  ;;  %v2626_v39 = vadd.f32 %v2625_v14, %v2624_v15 }
0x100b   :  { %v2398_v19 = vadd.f32 %v2390_v18, %v3738_v40  ;;  %v2393_v37 = vadd.f32 %v2760_v35, %v2626_v39 }
0x100d   :  { %2402 = vst [vmem:[#allocation17 + $0x10] sm:$0xff] %v2398_v19  ;;  %v2399_v63 = vadd.f32 %v2393_v37, %v3746_v21 }
0x100f   :  { %2403 = vst [vmem:[#allocation17 + $0x18] sm:$0xff] %v2399_v63 }
0x1010   :  { %3246 = shalt.err (!%p3243_p12)
}
0x1011   :  { %s3247_s19 = scalar_lea.hbm %s3852_s10, 512 }
0x1012   :  { %p3248_p13 = scmp.ne.s32.totalorder %s3852_s10, %s3247_s19  ;;  %p3251_p0 = scmp.lt.u32.totalorder %s3247_s19, %s3852_s10 }
0x1014   :  { %p3253_p1 = pnand %p3251_p0, %p3248_p13 }
0x1016   :  { %3256 = shalt.err (!%p3253_p1)
}
0x1017   :  { %2415 = dma.vmem_to_hbm [thread:$0]  %s2410_s14, 512, %s3852_s10, [#allocation5], %s3271_s25, %s3271_s25, %s3272_s26  }
0x1018   :  { %3267 = dma.done.wait [#allocation5], 512  }
0x1019   :  { %3268 = vsyncadd [#allocation5], 4294966784 }
0x101a   :  { %2419 = vsyncpa [#allocation4], 1 }
0x101b   :  { %2420 = vsyncpa [#allocation7], 1 }
0x101c   :  { %2421 = vsyncpa [#allocation10], 1 }
0x101d   :  { %2422 = vsyncpa [#allocation13], 1 }
0x101e   :  { %2423 = vsyncpa [#allocation16], 1 }
0x101f   :  { %2424 = vsyncpa [#allocation5], 1 }

</bundles_post_ra>
